<compile_context>
chip_gen: v7x
topology: tpu7x:2x2x1
jax: 0.10.0
libtpu: 0.0.40
codegen_flags: <defaults>
</compile_context>

<pallas_src>
import functools

import jax
import jax.numpy as jnp
from jax.experimental import pallas as pl
from jax.experimental.pallas import tpu as pltpu

KERNEL_SIZE = 7
PAD = KERNEL_SIZE // 2


def _largest_divisor_leq(n, cap):
    for d in range(min(n, cap), 0, -1):
        if n % d == 0:
            return d
    return 1


def _conv_as_matrices(conv_w, H, W):
    """Expand the (1, 2, 7, 7) conv weight into matmul operands.

    band[c, ki]  : (W, W) with band[c, ki][b, j] = w[c, ki, b - j + PAD]
    vshift[ki]   : (H, H) with vshift[ki][i, a] = (a == i + ki - PAD)
    so that conv(feat)[i, j] = sum_{c, ki} (vshift[ki] @ feat_c @ band[c, ki])[i, j]
    with zero padding on the spatial borders handled by the band structure.
    """
    w = conv_w.reshape(2, KERNEL_SIZE, KERNEL_SIZE).astype(jnp.float32)

    b_idx = jnp.arange(W)[:, None]
    j_idx = jnp.arange(W)[None, :]
    kj = b_idx - j_idx + PAD                                   # (W, W)
    valid = (kj >= 0) & (kj < KERNEL_SIZE)
    kj_clipped = jnp.clip(kj, 0, KERNEL_SIZE - 1)
    band = w[:, :, kj_clipped] * valid[None, None].astype(jnp.float32)  # (2,7,W,W)

    ks = jnp.arange(KERNEL_SIZE)[:, None, None]
    i_idx = jnp.arange(H)[None, :, None]
    a_idx = jnp.arange(H)[None, None, :]
    vshift = (a_idx == i_idx + (ks - PAD)).astype(jnp.float32)          # (7,H,H)
    return band, vshift


def _spatial_attn_kernel(x_ref, band_ref, vshift_ref, o_ref, sum_ref, max_ref,
                         *, channels, c_tile):
    # x_ref     : VMEM (1, c_tile, H, W), native dtype
    # band_ref  : VMEM (2, 7, W, W) f32     (horizontal conv taps as band matrices)
    # vshift_ref: VMEM (7, H, H) f32        (vertical 0/1 shift matrices)
    # o_ref     : VMEM (1, 1, H, W)
    # sum_ref/max_ref: VMEM (H, W) f32 accumulators, persist across the C axis.
    k = pl.program_id(1)

    @pl.when(k == 0)
    def _init():
        sum_ref[...] = jnp.zeros_like(sum_ref)
        max_ref[...] = jnp.full(max_ref.shape, -jnp.inf, dtype=max_ref.dtype)

    # Channel-block reduction: one plane at a time keeps vreg live ranges small
    # and lets the DMA move native-dtype (e.g. bf16) bytes.
    s = sum_ref[...]
    m = max_ref[...]
    for c in range(c_tile):
        p = x_ref[0, c].astype(jnp.float32)           # (H, W)
        s = s + p
        m = jnp.maximum(m, p)
    sum_ref[...] = s
    max_ref[...] = m

    @pl.when(k == pl.num_programs(1) - 1)
    def _finalize():
        planes = (sum_ref[...] * jnp.float32(1.0 / channels),  # channel mean
                  max_ref[...])                                # channel max
        H, W = planes[0].shape
        # Two independent accumulators so the 14 adds don't form one chain.
        acc0 = jnp.zeros((H, W), jnp.float32)
        acc1 = jnp.zeros((H, W), jnp.float32)
        for c in range(2):
            for ki in range(KERNEL_SIZE):
                t = jnp.dot(planes[c], band_ref[c, ki],
                            preferred_element_type=jnp.float32,
                            precision=jax.lax.Precision.HIGHEST)   # (H, W)
                contrib = jnp.dot(vshift_ref[ki], t,
                                  preferred_element_type=jnp.float32,
                                  precision=jax.lax.Precision.HIGHEST)
                if (c * KERNEL_SIZE + ki) % 2 == 0:
                    acc0 = acc0 + contrib
                else:
                    acc1 = acc1 + contrib
        o_ref[0, 0] = jax.nn.sigmoid(acc0 + acc1).astype(o_ref.dtype)


@functools.partial(jax.jit, static_argnames=("c_tile",))
def spatial_attention(x, conv_w, c_tile=None):
    """x: (B, C, H, W); conv_w: (1, 2, 7, 7) -> attention map (B, 1, H, W)."""
    B, C, H, W = x.shape
    if c_tile is None:
        c_tile = _largest_divisor_leq(C, 8)
    if C % c_tile != 0:
        raise ValueError(f"c_tile={c_tile} must divide C={C}")
    num_k = C // c_tile

    band, vshift = _conv_as_matrices(conv_w, H, W)

    kernel = functools.partial(_spatial_attn_kernel, channels=C, c_tile=c_tile)

    return pl.pallas_call(
        kernel,
        out_shape=jax.ShapeDtypeStruct((B, 1, H, W), x.dtype),
        grid=(B, num_k),
        in_specs=[
            # Per-step channel block of x, native dtype, pipelined over (b, k).
            pl.BlockSpec((1, c_tile, H, W), lambda b, k: (b, k, 0, 0)),
            # Conv operands: constant block index -> fetched once, stays in VMEM.
            pl.BlockSpec((2, KERNEL_SIZE, W, W), lambda b, k: (0, 0, 0, 0)),
            pl.BlockSpec((KERNEL_SIZE, H, H), lambda b, k: (0, 0, 0)),
        ],
        # Same output block across k -> resident accumulator target, written at
        # the last k step only.
        out_specs=pl.BlockSpec((1, 1, H, W), lambda b, k: (b, 0, 0, 0)),
        scratch_shapes=[
            pltpu.VMEM((H, W), jnp.float32),   # running channel sum
            pltpu.VMEM((H, W), jnp.float32),   # running channel max
        ],
        compiler_params=pltpu.CompilerParams(
            dimension_semantics=("parallel", "arbitrary"),
            vmem_limit_bytes=32 * 1024 * 1024,
        ),
    )(x, band, vshift)


def _reference(x, conv_w):
    """Pure-JAX reference mirroring the PyTorch forward."""
    avg_out = jnp.mean(x, axis=1, keepdims=True)
    max_out = jnp.max(x, axis=1, keepdims=True)
    feat = jnp.concatenate([avg_out, max_out], axis=1)        # (B, 2, H, W)
    y = jax.lax.conv_general_dilated(
        feat.astype(jnp.float32),
        conv_w.astype(jnp.float32),
        window_strides=(1, 1),
        padding=[(PAD, PAD), (PAD, PAD)],
        dimension_numbers=("NCHW", "OIHW", "NCHW"),
        precision=jax.lax.Precision.HIGHEST,
    )
    return jax.nn.sigmoid(y).astype(x.dtype)


if __name__ == "__main__":
    key = jax.random.PRNGKey(0)
    kx, kw = jax.random.split(key)

    B, C, H, W = 2, 4, 16, 16
    x = jax.random.normal(kx, (B, C, H, W), dtype=jnp.float32)
    # Deterministic conv weight, shape (out=1, in=2, 7, 7), no bias.
    conv_w = (jax.random.normal(kw, (1, 2, KERNEL_SIZE, KERNEL_SIZE),
                                dtype=jnp.float32) * 0.1)

    # c_tile=2 -> two channel-reduction steps per batch (exercises the
    # init / accumulate / finalize path).
    out = spatial_attention(x, conv_w, c_tile=2)
    out = jax.block_until_ready(out)

    ref = _reference(x, conv_w)
    assert out.shape == (B, 1, H, W), out.shape
    max_err = float(jnp.max(jnp.abs(out - ref)))
    assert jnp.allclose(out, ref, rtol=1e-4, atol=1e-5), max_err

    print("KERNEL_OK")
</pallas_src>

<mosaic_0001>
module attributes {stable_mosaic.version = 11 : i64} {
  func.func @_spatial_attn_kernel(%arg0: i32, %arg1: i32, %arg2: memref<1x2x16x16xf32, #tpu.memory_space<vmem>>, %arg3: memref<2x7x16x16xf32, #tpu.memory_space<vmem>>, %arg4: memref<7x16x16xf32, #tpu.memory_space<vmem>>, %arg5: memref<1x1x16x16xf32, #tpu.memory_space<vmem>>, %arg6: memref<16x16xf32, #tpu.memory_space<vmem>>, %arg7: memref<16x16xf32, #tpu.memory_space<vmem>>) attributes {dimension_semantics = [#tpu.dimension_semantics<parallel>, #tpu.dimension_semantics<arbitrary>], iteration_bounds = array<i64: 2, 2>, scalar_prefetch = 0 : i64, scratch_operands = 2 : i64, tpu.core_type = #tpu.core_type<tc>, window_params = [{transform_indices = @transform_0, window_bounds = array<i64: 1, 2, 16, 16>}, {pipeline_mode = #tpu.pipeline_mode<synchronous>, transform_indices = @transform_1, window_bounds = array<i64: 2, 7, 16, 16>}, {pipeline_mode = #tpu.pipeline_mode<synchronous>, transform_indices = @transform_2, window_bounds = array<i64: 7, 16, 16>}, {transform_indices = @transform_3, window_bounds = array<i64: 1, 1, 16, 16>}]} {
    %c0_i32 = arith.constant 0 : i32
    %0 = arith.cmpi eq, %arg1, %c0_i32 : i32
    %1 = arith.extui %0 : i1 to i32
    %c0_i32_0 = arith.constant 0 : i32
    %2 = arith.cmpi ne, %1, %c0_i32_0 : i32
    scf.if %2 {
      %cst = arith.constant 0.000000e+00 : f32
      %18 = vector.broadcast %cst : f32 to vector<16x16xf32>
      %c0_16 = arith.constant 0 : index
      %c0_17 = arith.constant 0 : index
      %19 = vector.load %arg6[%c0_16, %c0_17] : memref<16x16xf32, #tpu.memory_space<vmem>>, vector<16x16xf32>
      tpu.vector_store %arg6[%c0_16, %c0_17], %18 {strides = array<i32>} : memref<16x16xf32, #tpu.memory_space<vmem>>, vector<16x16xf32>,
      %cst_18 = arith.constant 0xFF800000 : f32
      %20 = vector.broadcast %cst_18 : f32 to vector<16x16xf32>
      %c0_19 = arith.constant 0 : index
      %c0_20 = arith.constant 0 : index
      %21 = vector.load %arg7[%c0_19, %c0_20] : memref<16x16xf32, #tpu.memory_space<vmem>>, vector<16x16xf32>
      tpu.vector_store %arg7[%c0_19, %c0_20], %20 {strides = array<i32>} : memref<16x16xf32, #tpu.memory_space<vmem>>, vector<16x16xf32>,
    } else {
    }
    %c0 = arith.constant 0 : index
    %c0_1 = arith.constant 0 : index
    %3 = vector.load %arg6[%c0, %c0_1] : memref<16x16xf32, #tpu.memory_space<vmem>>, vector<16x16xf32>
    %c0_2 = arith.constant 0 : index
    %c0_3 = arith.constant 0 : index
    %4 = vector.load %arg7[%c0_2, %c0_3] : memref<16x16xf32, #tpu.memory_space<vmem>>, vector<16x16xf32>
    %c0_4 = arith.constant 0 : index
    %c0_5 = arith.constant 0 : index
    %c0_6 = arith.constant 0 : index
    %c0_7 = arith.constant 0 : index
    %5 = vector.load %arg2[%c0_4, %c0_5, %c0_6, %c0_7] : memref<1x2x16x16xf32, #tpu.memory_space<vmem>>, vector<1x1x16x16xf32>
    %6 = vector.shape_cast %5 : vector<1x1x16x16xf32> to vector<16x16xf32>
    %7 = arith.addf %3, %6 : vector<16x16xf32>
    %8 = arith.maximumf %4, %6 : vector<16x16xf32>
    %c0_8 = arith.constant 0 : index
    %c1 = arith.constant 1 : index
    %c0_9 = arith.constant 0 : index
    %c0_10 = arith.constant 0 : index
    %9 = vector.load %arg2[%c0_8, %c1, %c0_9, %c0_10] : memref<1x2x16x16xf32, #tpu.memory_space<vmem>>, vector<1x1x16x16xf32>
    %10 = vector.shape_cast %9 : vector<1x1x16x16xf32> to vector<16x16xf32>
    %11 = arith.addf %7, %10 : vector<16x16xf32>
    %12 = arith.maximumf %8, %10 : vector<16x16xf32>
    %c0_11 = arith.constant 0 : index
    %c0_12 = arith.constant 0 : index
    %13 = vector.load %arg6[%c0_11, %c0_12] : memref<16x16xf32, #tpu.memory_space<vmem>>, vector<16x16xf32>
    tpu.vector_store %arg6[%c0_11, %c0_12], %11 {strides = array<i32>} : memref<16x16xf32, #tpu.memory_space<vmem>>, vector<16x16xf32>,
    %c0_13 = arith.constant 0 : index
    %c0_14 = arith.constant 0 : index
    %14 = vector.load %arg7[%c0_13, %c0_14] : memref<16x16xf32, #tpu.memory_space<vmem>>, vector<16x16xf32>
    tpu.vector_store %arg7[%c0_13, %c0_14], %12 {strides = array<i32>} : memref<16x16xf32, #tpu.memory_space<vmem>>, vector<16x16xf32>,
    %c1_i32 = arith.constant 1 : i32
    %15 = arith.cmpi eq, %arg1, %c1_i32 : i32
    %16 = arith.extui %15 : i1 to i32
    %c0_i32_15 = arith.constant 0 : i32
    %17 = arith.cmpi ne, %16, %c0_i32_15 : i32
    scf.if %17 {
      %c0_16 = arith.constant 0 : index
      %c0_17 = arith.constant 0 : index
      %18 = vector.load %arg6[%c0_16, %c0_17] : memref<16x16xf32, #tpu.memory_space<vmem>>, vector<16x16xf32>
      %cst = arith.constant 2.500000e-01 : f32
      %19 = vector.broadcast %cst : f32 to vector<16x16xf32>
      %20 = arith.mulf %18, %19 : vector<16x16xf32>
      %c0_18 = arith.constant 0 : index
      %c0_19 = arith.constant 0 : index
      %21 = vector.load %arg7[%c0_18, %c0_19] : memref<16x16xf32, #tpu.memory_space<vmem>>, vector<16x16xf32>
      %cst_20 = arith.constant 0.000000e+00 : f32
      %22 = vector.broadcast %cst_20 : f32 to vector<16x16xf32>
      %cst_21 = arith.constant 0.000000e+00 : f32
      %23 = vector.broadcast %cst_21 : f32 to vector<16x16xf32>
      %c0_22 = arith.constant 0 : index
      %c0_23 = arith.constant 0 : index
      %c0_24 = arith.constant 0 : index
      %c0_25 = arith.constant 0 : index
      %24 = vector.load %arg3[%c0_22, %c0_23, %c0_24, %c0_25] : memref<2x7x16x16xf32, #tpu.memory_space<vmem>>, vector<1x1x16x16xf32>
      %25 = vector.shape_cast %24 : vector<1x1x16x16xf32> to vector<16x16xf32>
      %cst_26 = arith.constant dense<0.000000e+00> : vector<16x16xf32>
      %26 = tpu.matmul %20, %25, %cst_26 {dimension_numbers = #tpu.dot_dimension_numbers<[1], [0], [0], [1], [0, 0, 1, 1], [], []>, precision = #tpu.contract_precision<fp32>} : vector<16x16xf32>, vector<16x16xf32>, vector<16x16xf32> -> vector<16x16xf32>
      %c0_27 = arith.constant 0 : index
      %c0_28 = arith.constant 0 : index
      %c0_29 = arith.constant 0 : index
      %27 = vector.load %arg4[%c0_27, %c0_28, %c0_29] : memref<7x16x16xf32, #tpu.memory_space<vmem>>, vector<1x16x16xf32>
      %28 = vector.shape_cast %27 : vector<1x16x16xf32> to vector<16x16xf32>
      %cst_30 = arith.constant dense<0.000000e+00> : vector<16x16xf32>
      %29 = tpu.matmul %28, %26, %cst_30 {dimension_numbers = #tpu.dot_dimension_numbers<[1], [0], [0], [1], [0, 0, 1, 1], [], []>, precision = #tpu.contract_precision<fp32>} : vector<16x16xf32>, vector<16x16xf32>, vector<16x16xf32> -> vector<16x16xf32>
      %30 = arith.addf %22, %29 : vector<16x16xf32>
      %c0_31 = arith.constant 0 : index
      %c1_32 = arith.constant 1 : index
      %c0_33 = arith.constant 0 : index
      %c0_34 = arith.constant 0 : index
      %31 = vector.load %arg3[%c0_31, %c1_32, %c0_33, %c0_34] : memref<2x7x16x16xf32, #tpu.memory_space<vmem>>, vector<1x1x16x16xf32>
      %32 = vector.shape_cast %31 : vector<1x1x16x16xf32> to vector<16x16xf32>
      %cst_35 = arith.constant dense<0.000000e+00> : vector<16x16xf32>
      %33 = tpu.matmul %20, %32, %cst_35 {dimension_numbers = #tpu.dot_dimension_numbers<[1], [0], [0], [1], [0, 0, 1, 1], [], []>, precision = #tpu.contract_precision<fp32>} : vector<16x16xf32>, vector<16x16xf32>, vector<16x16xf32> -> vector<16x16xf32>
      %c1_36 = arith.constant 1 : index
      %c0_37 = arith.constant 0 : index
      %c0_38 = arith.constant 0 : index
      %34 = vector.load %arg4[%c1_36, %c0_37, %c0_38] : memref<7x16x16xf32, #tpu.memory_space<vmem>>, vector<1x16x16xf32>
      %35 = vector.shape_cast %34 : vector<1x16x16xf32> to vector<16x16xf32>
      %cst_39 = arith.constant dense<0.000000e+00> : vector<16x16xf32>
      %36 = tpu.matmul %35, %33, %cst_39 {dimension_numbers = #tpu.dot_dimension_numbers<[1], [0], [0], [1], [0, 0, 1, 1], [], []>, precision = #tpu.contract_precision<fp32>} : vector<16x16xf32>, vector<16x16xf32>, vector<16x16xf32> -> vector<16x16xf32>
      %37 = arith.addf %23, %36 : vector<16x16xf32>
      %c0_40 = arith.constant 0 : index
      %c2 = arith.constant 2 : index
      %c0_41 = arith.constant 0 : index
      %c0_42 = arith.constant 0 : index
      %38 = vector.load %arg3[%c0_40, %c2, %c0_41, %c0_42] : memref<2x7x16x16xf32, #tpu.memory_space<vmem>>, vector<1x1x16x16xf32>
      %39 = vector.shape_cast %38 : vector<1x1x16x16xf32> to vector<16x16xf32>
      %cst_43 = arith.constant dense<0.000000e+00> : vector<16x16xf32>
      %40 = tpu.matmul %20, %39, %cst_43 {dimension_numbers = #tpu.dot_dimension_numbers<[1], [0], [0], [1], [0, 0, 1, 1], [], []>, precision = #tpu.contract_precision<fp32>} : vector<16x16xf32>, vector<16x16xf32>, vector<16x16xf32> -> vector<16x16xf32>
      %c2_44 = arith.constant 2 : index
      %c0_45 = arith.constant 0 : index
      %c0_46 = arith.constant 0 : index
      %41 = vector.load %arg4[%c2_44, %c0_45, %c0_46] : memref<7x16x16xf32, #tpu.memory_space<vmem>>, vector<1x16x16xf32>
      %42 = vector.shape_cast %41 : vector<1x16x16xf32> to vector<16x16xf32>
      %cst_47 = arith.constant dense<0.000000e+00> : vector<16x16xf32>
      %43 = tpu.matmul %42, %40, %cst_47 {dimension_numbers = #tpu.dot_dimension_numbers<[1], [0], [0], [1], [0, 0, 1, 1], [], []>, precision = #tpu.contract_precision<fp32>} : vector<16x16xf32>, vector<16x16xf32>, vector<16x16xf32> -> vector<16x16xf32>
      %44 = arith.addf %30, %43 : vector<16x16xf32>
      %c0_48 = arith.constant 0 : index
      %c3 = arith.constant 3 : index
      %c0_49 = arith.constant 0 : index
      %c0_50 = arith.constant 0 : index
      %45 = vector.load %arg3[%c0_48, %c3, %c0_49, %c0_50] : memref<2x7x16x16xf32, #tpu.memory_space<vmem>>, vector<1x1x16x16xf32>
      %46 = vector.shape_cast %45 : vector<1x1x16x16xf32> to vector<16x16xf32>
      %cst_51 = arith.constant dense<0.000000e+00> : vector<16x16xf32>
      %47 = tpu.matmul %20, %46, %cst_51 {dimension_numbers = #tpu.dot_dimension_numbers<[1], [0], [0], [1], [0, 0, 1, 1], [], []>, precision = #tpu.contract_precision<fp32>} : vector<16x16xf32>, vector<16x16xf32>, vector<16x16xf32> -> vector<16x16xf32>
      %c3_52 = arith.constant 3 : index
      %c0_53 = arith.constant 0 : index
      %c0_54 = arith.constant 0 : index
      %48 = vector.load %arg4[%c3_52, %c0_53, %c0_54] : memref<7x16x16xf32, #tpu.memory_space<vmem>>, vector<1x16x16xf32>
      %49 = vector.shape_cast %48 : vector<1x16x16xf32> to vector<16x16xf32>
      %cst_55 = arith.constant dense<0.000000e+00> : vector<16x16xf32>
      %50 = tpu.matmul %49, %47, %cst_55 {dimension_numbers = #tpu.dot_dimension_numbers<[1], [0], [0], [1], [0, 0, 1, 1], [], []>, precision = #tpu.contract_precision<fp32>} : vector<16x16xf32>, vector<16x16xf32>, vector<16x16xf32> -> vector<16x16xf32>
      %51 = arith.addf %37, %50 : vector<16x16xf32>
      %c0_56 = arith.constant 0 : index
      %c4 = arith.constant 4 : index
      %c0_57 = arith.constant 0 : index
      %c0_58 = arith.constant 0 : index
      %52 = vector.load %arg3[%c0_56, %c4, %c0_57, %c0_58] : memref<2x7x16x16xf32, #tpu.memory_space<vmem>>, vector<1x1x16x16xf32>
      %53 = vector.shape_cast %52 : vector<1x1x16x16xf32> to vector<16x16xf32>
      %cst_59 = arith.constant dense<0.000000e+00> : vector<16x16xf32>
      %54 = tpu.matmul %20, %53, %cst_59 {dimension_numbers = #tpu.dot_dimension_numbers<[1], [0], [0], [1], [0, 0, 1, 1], [], []>, precision = #tpu.contract_precision<fp32>} : vector<16x16xf32>, vector<16x16xf32>, vector<16x16xf32> -> vector<16x16xf32>
      %c4_60 = arith.constant 4 : index
      %c0_61 = arith.constant 0 : index
      %c0_62 = arith.constant 0 : index
      %55 = vector.load %arg4[%c4_60, %c0_61, %c0_62] : memref<7x16x16xf32, #tpu.memory_space<vmem>>, vector<1x16x16xf32>
      %56 = vector.shape_cast %55 : vector<1x16x16xf32> to vector<16x16xf32>
      %cst_63 = arith.constant dense<0.000000e+00> : vector<16x16xf32>
      %57 = tpu.matmul %56, %54, %cst_63 {dimension_numbers = #tpu.dot_dimension_numbers<[1], [0], [0], [1], [0, 0, 1, 1], [], []>, precision = #tpu.contract_precision<fp32>} : vector<16x16xf32>, vector<16x16xf32>, vector<16x16xf32> -> vector<16x16xf32>
      %58 = arith.addf %44, %57 : vector<16x16xf32>
      %c0_64 = arith.constant 0 : index
      %c5 = arith.constant 5 : index
      %c0_65 = arith.constant 0 : index
      %c0_66 = arith.constant 0 : index
      %59 = vector.load %arg3[%c0_64, %c5, %c0_65, %c0_66] : memref<2x7x16x16xf32, #tpu.memory_space<vmem>>, vector<1x1x16x16xf32>
      %60 = vector.shape_cast %59 : vector<1x1x16x16xf32> to vector<16x16xf32>
      %cst_67 = arith.constant dense<0.000000e+00> : vector<16x16xf32>
      %61 = tpu.matmul %20, %60, %cst_67 {dimension_numbers = #tpu.dot_dimension_numbers<[1], [0], [0], [1], [0, 0, 1, 1], [], []>, precision = #tpu.contract_precision<fp32>} : vector<16x16xf32>, vector<16x16xf32>, vector<16x16xf32> -> vector<16x16xf32>
      %c5_68 = arith.constant 5 : index
      %c0_69 = arith.constant 0 : index
      %c0_70 = arith.constant 0 : index
      %62 = vector.load %arg4[%c5_68, %c0_69, %c0_70] : memref<7x16x16xf32, #tpu.memory_space<vmem>>, vector<1x16x16xf32>
      %63 = vector.shape_cast %62 : vector<1x16x16xf32> to vector<16x16xf32>
      %cst_71 = arith.constant dense<0.000000e+00> : vector<16x16xf32>
      %64 = tpu.matmul %63, %61, %cst_71 {dimension_numbers = #tpu.dot_dimension_numbers<[1], [0], [0], [1], [0, 0, 1, 1], [], []>, precision = #tpu.contract_precision<fp32>} : vector<16x16xf32>, vector<16x16xf32>, vector<16x16xf32> -> vector<16x16xf32>
      %65 = arith.addf %51, %64 : vector<16x16xf32>
      %c0_72 = arith.constant 0 : index
      %c6 = arith.constant 6 : index
      %c0_73 = arith.constant 0 : index
      %c0_74 = arith.constant 0 : index
      %66 = vector.load %arg3[%c0_72, %c6, %c0_73, %c0_74] : memref<2x7x16x16xf32, #tpu.memory_space<vmem>>, vector<1x1x16x16xf32>
      %67 = vector.shape_cast %66 : vector<1x1x16x16xf32> to vector<16x16xf32>
      %cst_75 = arith.constant dense<0.000000e+00> : vector<16x16xf32>
      %68 = tpu.matmul %20, %67, %cst_75 {dimension_numbers = #tpu.dot_dimension_numbers<[1], [0], [0], [1], [0, 0, 1, 1], [], []>, precision = #tpu.contract_precision<fp32>} : vector<16x16xf32>, vector<16x16xf32>, vector<16x16xf32> -> vector<16x16xf32>
      %c6_76 = arith.constant 6 : index
      %c0_77 = arith.constant 0 : index
      %c0_78 = arith.constant 0 : index
      %69 = vector.load %arg4[%c6_76, %c0_77, %c0_78] : memref<7x16x16xf32, #tpu.memory_space<vmem>>, vector<1x16x16xf32>
      %70 = vector.shape_cast %69 : vector<1x16x16xf32> to vector<16x16xf32>
      %cst_79 = arith.constant dense<0.000000e+00> : vector<16x16xf32>
      %71 = tpu.matmul %70, %68, %cst_79 {dimension_numbers = #tpu.dot_dimension_numbers<[1], [0], [0], [1], [0, 0, 1, 1], [], []>, precision = #tpu.contract_precision<fp32>} : vector<16x16xf32>, vector<16x16xf32>, vector<16x16xf32> -> vector<16x16xf32>
      %72 = arith.addf %58, %71 : vector<16x16xf32>
      %c1_80 = arith.constant 1 : index
      %c0_81 = arith.constant 0 : index
      %c0_82 = arith.constant 0 : index
      %c0_83 = arith.constant 0 : index
      %73 = vector.load %arg3[%c1_80, %c0_81, %c0_82, %c0_83] : memref<2x7x16x16xf32, #tpu.memory_space<vmem>>, vector<1x1x16x16xf32>
      %74 = vector.shape_cast %73 : vector<1x1x16x16xf32> to vector<16x16xf32>
      %cst_84 = arith.constant dense<0.000000e+00> : vector<16x16xf32>
      %75 = tpu.matmul %21, %74, %cst_84 {dimension_numbers = #tpu.dot_dimension_numbers<[1], [0], [0], [1], [0, 0, 1, 1], [], []>, precision = #tpu.contract_precision<fp32>} : vector<16x16xf32>, vector<16x16xf32>, vector<16x16xf32> -> vector<16x16xf32>
      %c0_85 = arith.constant 0 : index
      %c0_86 = arith.constant 0 : index
      %c0_87 = arith.constant 0 : index
      %76 = vector.load %arg4[%c0_85, %c0_86, %c0_87] : memref<7x16x16xf32, #tpu.memory_space<vmem>>, vector<1x16x16xf32>
      %77 = vector.shape_cast %76 : vector<1x16x16xf32> to vector<16x16xf32>
      %cst_88 = arith.constant dense<0.000000e+00> : vector<16x16xf32>
      %78 = tpu.matmul %77, %75, %cst_88 {dimension_numbers = #tpu.dot_dimension_numbers<[1], [0], [0], [1], [0, 0, 1, 1], [], []>, precision = #tpu.contract_precision<fp32>} : vector<16x16xf32>, vector<16x16xf32>, vector<16x16xf32> -> vector<16x16xf32>
      %79 = arith.addf %65, %78 : vector<16x16xf32>
      %c1_89 = arith.constant 1 : index
      %c1_90 = arith.constant 1 : index
      %c0_91 = arith.constant 0 : index
      %c0_92 = arith.constant 0 : index
      %80 = vector.load %arg3[%c1_89, %c1_90, %c0_91, %c0_92] : memref<2x7x16x16xf32, #tpu.memory_space<vmem>>, vector<1x1x16x16xf32>
      %81 = vector.shape_cast %80 : vector<1x1x16x16xf32> to vector<16x16xf32>
      %cst_93 = arith.constant dense<0.000000e+00> : vector<16x16xf32>
      %82 = tpu.matmul %21, %81, %cst_93 {dimension_numbers = #tpu.dot_dimension_numbers<[1], [0], [0], [1], [0, 0, 1, 1], [], []>, precision = #tpu.contract_precision<fp32>} : vector<16x16xf32>, vector<16x16xf32>, vector<16x16xf32> -> vector<16x16xf32>
      %c1_94 = arith.constant 1 : index
      %c0_95 = arith.constant 0 : index
      %c0_96 = arith.constant 0 : index
      %83 = vector.load %arg4[%c1_94, %c0_95, %c0_96] : memref<7x16x16xf32, #tpu.memory_space<vmem>>, vector<1x16x16xf32>
      %84 = vector.shape_cast %83 : vector<1x16x16xf32> to vector<16x16xf32>
      %cst_97 = arith.constant dense<0.000000e+00> : vector<16x16xf32>
      %85 = tpu.matmul %84, %82, %cst_97 {dimension_numbers = #tpu.dot_dimension_numbers<[1], [0], [0], [1], [0, 0, 1, 1], [], []>, precision = #tpu.contract_precision<fp32>} : vector<16x16xf32>, vector<16x16xf32>, vector<16x16xf32> -> vector<16x16xf32>
      %86 = arith.addf %72, %85 : vector<16x16xf32>
      %c1_98 = arith.constant 1 : index
      %c2_99 = arith.constant 2 : index
      %c0_100 = arith.constant 0 : index
      %c0_101 = arith.constant 0 : index
      %87 = vector.load %arg3[%c1_98, %c2_99, %c0_100, %c0_101] : memref<2x7x16x16xf32, #tpu.memory_space<vmem>>, vector<1x1x16x16xf32>
      %88 = vector.shape_cast %87 : vector<1x1x16x16xf32> to vector<16x16xf32>
      %cst_102 = arith.constant dense<0.000000e+00> : vector<16x16xf32>
      %89 = tpu.matmul %21, %88, %cst_102 {dimension_numbers = #tpu.dot_dimension_numbers<[1], [0], [0], [1], [0, 0, 1, 1], [], []>, precision = #tpu.contract_precision<fp32>} : vector<16x16xf32>, vector<16x16xf32>, vector<16x16xf32> -> vector<16x16xf32>
      %c2_103 = arith.constant 2 : index
      %c0_104 = arith.constant 0 : index
      %c0_105 = arith.constant 0 : index
      %90 = vector.load %arg4[%c2_103, %c0_104, %c0_105] : memref<7x16x16xf32, #tpu.memory_space<vmem>>, vector<1x16x16xf32>
      %91 = vector.shape_cast %90 : vector<1x16x16xf32> to vector<16x16xf32>
      %cst_106 = arith.constant dense<0.000000e+00> : vector<16x16xf32>
      %92 = tpu.matmul %91, %89, %cst_106 {dimension_numbers = #tpu.dot_dimension_numbers<[1], [0], [0], [1], [0, 0, 1, 1], [], []>, precision = #tpu.contract_precision<fp32>} : vector<16x16xf32>, vector<16x16xf32>, vector<16x16xf32> -> vector<16x16xf32>
      %93 = arith.addf %79, %92 : vector<16x16xf32>
      %c1_107 = arith.constant 1 : index
      %c3_108 = arith.constant 3 : index
      %c0_109 = arith.constant 0 : index
      %c0_110 = arith.constant 0 : index
      %94 = vector.load %arg3[%c1_107, %c3_108, %c0_109, %c0_110] : memref<2x7x16x16xf32, #tpu.memory_space<vmem>>, vector<1x1x16x16xf32>
      %95 = vector.shape_cast %94 : vector<1x1x16x16xf32> to vector<16x16xf32>
      %cst_111 = arith.constant dense<0.000000e+00> : vector<16x16xf32>
      %96 = tpu.matmul %21, %95, %cst_111 {dimension_numbers = #tpu.dot_dimension_numbers<[1], [0], [0], [1], [0, 0, 1, 1], [], []>, precision = #tpu.contract_precision<fp32>} : vector<16x16xf32>, vector<16x16xf32>, vector<16x16xf32> -> vector<16x16xf32>
      %c3_112 = arith.constant 3 : index
      %c0_113 = arith.constant 0 : index
      %c0_114 = arith.constant 0 : index
      %97 = vector.load %arg4[%c3_112, %c0_113, %c0_114] : memref<7x16x16xf32, #tpu.memory_space<vmem>>, vector<1x16x16xf32>
      %98 = vector.shape_cast %97 : vector<1x16x16xf32> to vector<16x16xf32>
      %cst_115 = arith.constant dense<0.000000e+00> : vector<16x16xf32>
      %99 = tpu.matmul %98, %96, %cst_115 {dimension_numbers = #tpu.dot_dimension_numbers<[1], [0], [0], [1], [0, 0, 1, 1], [], []>, precision = #tpu.contract_precision<fp32>} : vector<16x16xf32>, vector<16x16xf32>, vector<16x16xf32> -> vector<16x16xf32>
      %100 = arith.addf %86, %99 : vector<16x16xf32>
      %c1_116 = arith.constant 1 : index
      %c4_117 = arith.constant 4 : index
      %c0_118 = arith.constant 0 : index
      %c0_119 = arith.constant 0 : index
      %101 = vector.load %arg3[%c1_116, %c4_117, %c0_118, %c0_119] : memref<2x7x16x16xf32, #tpu.memory_space<vmem>>, vector<1x1x16x16xf32>
      %102 = vector.shape_cast %101 : vector<1x1x16x16xf32> to vector<16x16xf32>
      %cst_120 = arith.constant dense<0.000000e+00> : vector<16x16xf32>
      %103 = tpu.matmul %21, %102, %cst_120 {dimension_numbers = #tpu.dot_dimension_numbers<[1], [0], [0], [1], [0, 0, 1, 1], [], []>, precision = #tpu.contract_precision<fp32>} : vector<16x16xf32>, vector<16x16xf32>, vector<16x16xf32> -> vector<16x16xf32>
      %c4_121 = arith.constant 4 : index
      %c0_122 = arith.constant 0 : index
      %c0_123 = arith.constant 0 : index
      %104 = vector.load %arg4[%c4_121, %c0_122, %c0_123] : memref<7x16x16xf32, #tpu.memory_space<vmem>>, vector<1x16x16xf32>
      %105 = vector.shape_cast %104 : vector<1x16x16xf32> to vector<16x16xf32>
      %cst_124 = arith.constant dense<0.000000e+00> : vector<16x16xf32>
      %106 = tpu.matmul %105, %103, %cst_124 {dimension_numbers = #tpu.dot_dimension_numbers<[1], [0], [0], [1], [0, 0, 1, 1], [], []>, precision = #tpu.contract_precision<fp32>} : vector<16x16xf32>, vector<16x16xf32>, vector<16x16xf32> -> vector<16x16xf32>
      %107 = arith.addf %93, %106 : vector<16x16xf32>
      %c1_125 = arith.constant 1 : index
      %c5_126 = arith.constant 5 : index
      %c0_127 = arith.constant 0 : index
      %c0_128 = arith.constant 0 : index
      %108 = vector.load %arg3[%c1_125, %c5_126, %c0_127, %c0_128] : memref<2x7x16x16xf32, #tpu.memory_space<vmem>>, vector<1x1x16x16xf32>
      %109 = vector.shape_cast %108 : vector<1x1x16x16xf32> to vector<16x16xf32>
      %cst_129 = arith.constant dense<0.000000e+00> : vector<16x16xf32>
      %110 = tpu.matmul %21, %109, %cst_129 {dimension_numbers = #tpu.dot_dimension_numbers<[1], [0], [0], [1], [0, 0, 1, 1], [], []>, precision = #tpu.contract_precision<fp32>} : vector<16x16xf32>, vector<16x16xf32>, vector<16x16xf32> -> vector<16x16xf32>
      %c5_130 = arith.constant 5 : index
      %c0_131 = arith.constant 0 : index
      %c0_132 = arith.constant 0 : index
      %111 = vector.load %arg4[%c5_130, %c0_131, %c0_132] : memref<7x16x16xf32, #tpu.memory_space<vmem>>, vector<1x16x16xf32>
      %112 = vector.shape_cast %111 : vector<1x16x16xf32> to vector<16x16xf32>
      %cst_133 = arith.constant dense<0.000000e+00> : vector<16x16xf32>
      %113 = tpu.matmul %112, %110, %cst_133 {dimension_numbers = #tpu.dot_dimension_numbers<[1], [0], [0], [1], [0, 0, 1, 1], [], []>, precision = #tpu.contract_precision<fp32>} : vector<16x16xf32>, vector<16x16xf32>, vector<16x16xf32> -> vector<16x16xf32>
      %114 = arith.addf %100, %113 : vector<16x16xf32>
      %c1_134 = arith.constant 1 : index
      %c6_135 = arith.constant 6 : index
      %c0_136 = arith.constant 0 : index
      %c0_137 = arith.constant 0 : index
      %115 = vector.load %arg3[%c1_134, %c6_135, %c0_136, %c0_137] : memref<2x7x16x16xf32, #tpu.memory_space<vmem>>, vector<1x1x16x16xf32>
      %116 = vector.shape_cast %115 : vector<1x1x16x16xf32> to vector<16x16xf32>
      %cst_138 = arith.constant dense<0.000000e+00> : vector<16x16xf32>
      %117 = tpu.matmul %21, %116, %cst_138 {dimension_numbers = #tpu.dot_dimension_numbers<[1], [0], [0], [1], [0, 0, 1, 1], [], []>, precision = #tpu.contract_precision<fp32>} : vector<16x16xf32>, vector<16x16xf32>, vector<16x16xf32> -> vector<16x16xf32>
      %c6_139 = arith.constant 6 : index
      %c0_140 = arith.constant 0 : index
      %c0_141 = arith.constant 0 : index
      %118 = vector.load %arg4[%c6_139, %c0_140, %c0_141] : memref<7x16x16xf32, #tpu.memory_space<vmem>>, vector<1x16x16xf32>
      %119 = vector.shape_cast %118 : vector<1x16x16xf32> to vector<16x16xf32>
      %cst_142 = arith.constant dense<0.000000e+00> : vector<16x16xf32>
      %120 = tpu.matmul %119, %117, %cst_142 {dimension_numbers = #tpu.dot_dimension_numbers<[1], [0], [0], [1], [0, 0, 1, 1], [], []>, precision = #tpu.contract_precision<fp32>} : vector<16x16xf32>, vector<16x16xf32>, vector<16x16xf32> -> vector<16x16xf32>
      %121 = arith.addf %107, %120 : vector<16x16xf32>
      %122 = arith.addf %114, %121 : vector<16x16xf32>
      %123 = arith.negf %122 : vector<16x16xf32>
      %124 = math.exp %123 : vector<16x16xf32>
      %cst_143 = arith.constant 1.000000e+00 : f32
      %125 = vector.broadcast %cst_143 : f32 to vector<16x16xf32>
      %126 = arith.addf %125, %124 : vector<16x16xf32>
      %127 = arith.divf %125, %126 : vector<16x16xf32>
      %c0_144 = arith.constant 0 : index
      %c0_145 = arith.constant 0 : index
      %c0_146 = arith.constant 0 : index
      %c0_147 = arith.constant 0 : index
      %128 = vector.load %arg5[%c0_144, %c0_145, %c0_146, %c0_147] : memref<1x1x16x16xf32, #tpu.memory_space<vmem>>, vector<1x1x16x16xf32>
      %129 = vector.shape_cast %128 : vector<1x1x16x16xf32> to vector<16x16xf32>
      %130 = vector.shape_cast %127 : vector<16x16xf32> to vector<1x1x16x16xf32>
      tpu.vector_store %arg5[%c0_144, %c0_145, %c0_146, %c0_147], %130 {strides = array<i32>} : memref<1x1x16x16xf32, #tpu.memory_space<vmem>>, vector<1x1x16x16xf32>,
    } else {
    }
    return
  }
  func.func @transform_0(%arg0: i32, %arg1: i32) -> (i32, i32, i32, i32) {
    %c0_i32 = arith.constant 0 : i32
    %c0_i32_0 = arith.constant 0 : i32
    %c0_i32_1 = arith.constant 0 : i32
    return %arg0, %arg1, %c0_i32, %c0_i32_0 : i32, i32, i32, i32
  }
  func.func @transform_1(%arg0: i32, %arg1: i32) -> (i32, i32, i32, i32) {
    %c0_i32 = arith.constant 0 : i32
    %c0_i32_0 = arith.constant 0 : i32
    %c0_i32_1 = arith.constant 0 : i32
    %c0_i32_2 = arith.constant 0 : i32
    %c0_i32_3 = arith.constant 0 : i32
    return %c0_i32, %c0_i32_0, %c0_i32_1, %c0_i32_2 : i32, i32, i32, i32
  }
  func.func @transform_2(%arg0: i32, %arg1: i32) -> (i32, i32, i32) {
    %c0_i32 = arith.constant 0 : i32
    %c0_i32_0 = arith.constant 0 : i32
    %c0_i32_1 = arith.constant 0 : i32
    %c0_i32_2 = arith.constant 0 : i32
    return %c0_i32, %c0_i32_0, %c0_i32_1 : i32, i32, i32
  }
  func.func @transform_3(%arg0: i32, %arg1: i32) -> (i32, i32, i32, i32) {
    %c0_i32 = arith.constant 0 : i32
    %c0_i32_0 = arith.constant 0 : i32
    %c0_i32_1 = arith.constant 0 : i32
    %c0_i32_2 = arith.constant 0 : i32
    return %arg0, %c0_i32, %c0_i32_0, %c0_i32_1 : i32, i32, i32, i32
  }
}

</mosaic_0001>

<bundles_post_ra>
// kernel: spatial_attention.1
= control target key start
LH: loop header
LB: loop body
LE: loop exit
PB: predicated region body
PF: predicated region fallthrough
CT: control target
= control target key end

     0   :  { %8 = vsyncpa [#allocation5], 0  ;;  %s18915_s0 = inlined_call_operand.vmem [shape: f32[2,4,16,16], index: 0, kind: input, shape index: {}]   ;;  %s18916_s1 = inlined_call_operand.vmem [shape: f32[2,7,16,16], index: 1, kind: input, shape index: {}]   ;;  %s18917_s2 = inlined_call_operand.vmem [shape: f32[7,16,16], index: 2, kind: input, shape index: {}]   ;;  %s18918_s3 = inlined_call_operand.hbm [shape: f32[2,1,16,16], index: 3, kind: output, shape index: {}]  }
   0x1   :  { %10 = vsyncpa [#allocation5 + $0x1], 0  ;;  %s17634_s12 = smov 0   ;;  %s17636_s13 = smov 0  }
   0x2   :  { %s17638_s14 = smov 0   ;;  %s17640_s15 = smov 0  }
   0x3   :  { %s17642_s16 = smov 0   ;;  %s17644_s17 = smov 0  }
   0x4   :  { %s17646_s18 = smov 0   ;;  %s17648_s19 = smov 0  }
   0x5 LB: > { %s14544_s20 = sadd.s32 4294967295, %s17607_s19   ;;  %s14545_s21 = sadd.s32 4294967294, %s17607_s19   ;;  %s17607_s19 = sphi %s17648_s19, %s16_s19   ;;  %s17603_s18 = sphi %s17646_s18, %s18989_s18   ;;  %s17599_s17 = sphi %s17644_s17, %s18988_s17   ;;  %s17595_s16 = sphi %s17642_s16, %s18987_s16   ;;  %s17591_s15 = sphi %s17640_s15, %s18986_s15   ;;  %s17587_s14 = sphi %s17638_s14, %s18985_s14   ;;  %s17583_s13 = sphi %s17636_s13, %s18984_s13   ;;  %s17579_s12 = sphi %s17634_s12, %s18983_s12  }
   0x6   : > { %s25_s22 = sadd.s32 1, %s17599_s17  ;;  %s28_s23 = sadd.s32 1, %s17603_s18 }
   0x7   : > { %p26_p0 = scmp.ge.s32.totalorder %s25_s22, 2  ;;  %p115_p1 = scmp.ne.s32.totalorder %s17587_s14, %s17583_s13 }
   0x8   : > { %p116_p2 = scmp.eq.s32.totalorder %s14544_s20, 3  ;;  %p121_p4 = scmp.ne.s32.totalorder %s17583_s13, %s17579_s12 }
   0x9   : > { %s18991_s22 = smov (%p26_p0, %s25_s22), 0  ;;  %s18993_s23 = smov (!%p26_p0, %s28_s23), %s17603_s18 }
   0xa   : > { %p17683_p3 = por %p116_p2, %p115_p1  ;;  %p30_p5 = scmp.ge.s32.totalorder %s18993_s23, 2 }
   0xb   : > { %p122_p6 = scmp.eq.s32.totalorder %s14545_s21, 3  ;;  %p14548_p7 = scmp.ge.s32.totalorder %s17607_s19, 1 }
   0xc   : > { %p160_p8 = scmp.lt.s32.totalorder %s17607_s19, 5  ;;  %s18995_s23 = smov (%p30_p5, %s18993_s23), 0 }
   0xd   : > { %p17693_p9 = por %p122_p6, %p121_p4  ;;  %s102_s26 = ssub.s32 %s17603_s18, %s18995_s23 }
   0xe   : > { %p161_p10 = pnand %p14548_p7, %p160_p8  ;;  %s105_s27 = sadd.s32 1, %s17587_s14 }
   0xf   : > { %p103_p11 = scmp.eq.s32.totalorder %s102_s26, 0  ;;  %s186_s29 = sand.u32 (!%p161_p10), 1, %s17583_s13  }
  0x10   : > { %164 = sbr.rel (%p161_p10) target bundleno = 1338 (0x53a), region = 32  ;;  %s14550_s30 = sshll.u32 (!%p161_p10), %s17591_s15, 1 }
  0x11   : > { %s17701_s28 = scalar_select %p103_p11, %s17587_s14, %s105_s27  }
  0x12   : > { %s14549_s4 = sshll.u32 (!%p161_p10), %s186_s29, 4  ;;  %p190_p12 = scmp.lt.s32.totalorder (!%p161_p10), %s17595_s16, 1 }
  0x13   : > { %p192_p13 = scmp.lt.s32.totalorder (!%p161_p10), %s14550_s30, 3  ;;  %s17712_s21 = scalar_lea.vmem (!%p161_p10), [#allocation4], %s14549_s4 }
  0x14   : > { %p14554_p0 = scmp.ne.s32.totalorder (!%p161_p10), %s17591_s15, 0 }
  0x17   : > { %s191_s5 = scalar_select %p190_p12, %s17595_s16, 1 }
  0x18   : > { %s18997_s30 = smov (!%p192_p13, %s14550_s30), 3  ;;  %203 = sbr.rel (%p14554_p0) target bundleno = 31 (0x1f), region = 36 }
  0x19   : > { %s14552_s6 = sshll.u32 %s191_s5, 3  ;;  %s14551_s7 = sshll.u32 %s18997_s30, 1  ;;  %vm204_vm0 = vcmask (!%p14554_p0), 130048   ;;  %v17609_v0 = vmov (!%p14554_p0), 0.0   ;;  %v17610_v1 = vmov (!%p14554_p0), -inf  }
  0x1a   : > { %s196_s8 = sadd.s32 %s14552_s6, %s14551_s7  ;;  %205 = vst.msk [vmem:[#allocation2] sm:$0xff] (!%p14554_p0), %vm204_vm0, %v17609_v0  ;;  %206 = vst.msk [vmem:[#allocation2 + $0x8] sm:$0xff] (!%p14554_p0), %vm204_vm0, %v17609_v0 }
  0x1b   : > { %s14553_s9 = sshll.u32 %s196_s8, 3  ;;  %207 = vst.msk [vmem:[#allocation3] sm:$0xff] (!%p14554_p0), %vm204_vm0, %v17610_v1  ;;  %208 = vst.msk [vmem:[#allocation3 + $0x8] sm:$0xff] (!%p14554_p0), %vm204_vm0, %v17610_v1 }
  0x1c   : > { %s198_s20 = scalar_lea.vmem %s18915_s0, %s14553_s9 }
  0x1f PF: > { %v213_v3 = vld [vmem:[%s198_s20] sm:$0xff]  ;;  %v14555_v4 = vld [vmem:[%s198_s20 + $0x10] sm:$0xff]  ;;  %v214_v7 = vld [vmem:[%s198_s20 + $0x8] sm:$0xff]  ;;  %vm226_vm1 = vcmask 130048   ;;  %p14557_p1 = scmp.ne.s32.totalorder %s17591_s15, 1 }
  0x20   : > { %v14556_v8 = vld [vmem:[%s198_s20 + $0x18] sm:$0xff] }
  0x21   : > { %v209_v2 = vld [vmem:[#allocation2] sm:$0xff]  ;;  %v210_v6 = vld [vmem:[#allocation2 + $0x8] sm:$0xff]  ;;  %234 = sbr.rel (%p14557_p1) target bundleno = 1313 (0x521), region = 40 }
  0x22   : > { %v215_v5 = vadd.f32 %v213_v3, %v209_v2  ;;  %v216_v9 = vadd.f32 %v214_v7, %v210_v6  ;;  %v211_v10 = vld [vmem:[#allocation3] sm:$0xff]  ;;  %v212_v11 = vld [vmem:[#allocation3 + $0x8] sm:$0xff] }
  0x23   : > { %v217_v13 = vmax.f32 %v211_v10, %v213_v3  ;;  %v218_v14 = vmax.f32 %v212_v11, %v214_v7 }
  0x24   : > { %v222_v12 = vadd.f32 %v14555_v4, %v215_v5  ;;  %v223_v15 = vadd.f32 %v14556_v8, %v216_v9 }
  0x25   : > { %v224_v16 = vmax.f32 %v217_v13, %v14555_v4  ;;  %v225_v17 = vmax.f32 %v218_v14, %v14556_v8 }
  0x26   : > { %227 = vst.msk [vmem:[#allocation2] sm:$0xff] %vm226_vm1, %v222_v12  ;;  %228 = vst.msk [vmem:[#allocation2 + $0x8] sm:$0xff] %vm226_vm1, %v223_v15 }
  0x27   : > { %229 = vst.msk [vmem:[#allocation3] sm:$0xff] %vm226_vm1, %v224_v16  ;;  %230 = vst.msk [vmem:[#allocation3 + $0x8] sm:$0xff] %vm226_vm1, %v225_v17 }
  0x28   : > { %v241_v18 = vld [vmem:[%s18916_s1] sm:$0xff]  ;;  %v242_v19 = vld [vmem:[%s18916_s1 + $0x8] sm:$0xff]  ;;  %v14558_v50 = vld [vmem:[%s18916_s1 + $0x10] sm:$0xff] }
  0x29   : > { %v250_v21 = vand.u32 4294901760, %v241_v18  ;;  %v253_v22 = vand.u32 4294901760, %v242_v19  ;;  %v14559_v51 = vld [vmem:[%s18916_s1 + $0x18] sm:$0xff]  ;;  %v757_v52 = vand.u32 4294901760, %v14558_v50  ;;  %v14562_v2 = vld [vmem:[%s18916_s1 + $0x20] sm:$0xff]  ;;  %v14563_v3 = vld [vmem:[%s18916_s1 + $0x28] sm:$0xff] }
  0x2a   : > { %v760_v53 = vand.u32 4294901760, %v14559_v51  ;;  %v1265_v4 = vand.u32 4294901760, %v14562_v2  ;;  %v1268_v5 = vand.u32 4294901760, %v14563_v3 }
  0x2b   : > { %v16452_v26 = vpack.c.bf16 %v253_v22, %v250_v21  ;;  %v338_v28 = vsub.f32 %v241_v18, %v250_v21  ;;  %v345_v29 = vsub.f32 %v242_v19, %v253_v22  ;;  %v845_v54 = vsub.f32 %v14558_v50, %v757_v52  ;;  %v14566_v18 = vld [vmem:[%s18916_s1 + $0x30] sm:$0xff]  ;;  %v14567_v19 = vld [vmem:[%s18916_s1 + $0x38] sm:$0xff] }
  0x2c   : > { %v852_v55 = vsub.f32 %v14559_v51, %v760_v53  ;;  %v16476_v58 = vpack.c.bf16 %v760_v53, %v757_v52  ;;  %v1353_v6 = vsub.f32 %v14562_v2, %v1265_v4  ;;  %v1360_v7 = vsub.f32 %v14563_v3, %v1268_v5 }
  0x2d   : > { %v235_v20 = vld [vmem:[#allocation2] sm:$0xff]  ;;  %v236_v24 = vld [vmem:[#allocation2 + $0x8] sm:$0xff]  ;;  %16453 = vmatprep.subr.bf16.mxu0 %v16452_v26  ;;  %v339_v33 = vand.u32 4294901760, %v338_v28  ;;  %v346_v34 = vand.u32 4294901760, %v345_v29  ;;  %v16460_v48 = vpack.c.bf16 %v345_v29, %v338_v28  ;;  %v846_v56 = vand.u32 4294901760, %v845_v54 }
  0x2e   : > { %v237_v23 = vmul.f32 0.25, %v235_v20  ;;  %v238_v25 = vmul.f32 0.25, %v236_v24  ;;  %16455 = vmatpush3.bf16.msra.mxu0 %v16452_v26  ;;  %v853_v57 = vand.u32 4294901760, %v852_v55  ;;  %v16484_v0 = vpack.c.bf16 %v852_v55, %v845_v54 }
  0x2f   : > { %v340_v37 = vsub.f32 %v338_v28, %v339_v33  ;;  %v347_v38 = vsub.f32 %v345_v29, %v346_v34  ;;  %v16468_v49 = vpack.c.bf16 %v346_v34, %v339_v33  ;;  %v847_v59 = vsub.f32 %v845_v54, %v846_v56 }
  0x30   : > { %v244_v27 = vsel %vm226_vm1, %v237_v23, 0  ;;  %v247_v31 = vsel %vm226_vm1, %v238_v25, 0  ;;  %v854_v60 = vsub.f32 %v852_v55, %v853_v57  ;;  %v16492_v1 = vpack.c.bf16 %v853_v57, %v846_v56 }
  0x31   : > { %v17727_v30 = vand.u32 4294901760, %v244_v27  ;;  %v17730_v32 = vand.u32 4294901760, %v247_v31  ;;  %v341_v41 = vand.u32 4294901760, %v340_v37  ;;  %v348_v42 = vand.u32 4294901760, %v347_v38  ;;  %v14570_v38 = vld [vmem:[%s18916_s1 + $0x40] sm:$0xff] }
  0x32   : > { %v848_v61 = vand.u32 4294901760, %v847_v59  ;;  %v855_v62 = vand.u32 4294901760, %v854_v60  ;;  %v1354_v8 = vand.u32 4294901760, %v1353_v6  ;;  %v1361_v9 = vand.u32 4294901760, %v1360_v7  ;;  %v14575_v59 = vld [vmem:[%s18916_s1 + $0x58] sm:$0xff] }
  0x33   : > { %v17733_v35 = vsub.f32 %v244_v27, %v17727_v30  ;;  %v17736_v36 = vsub.f32 %v247_v31, %v17730_v32  ;;  %v16456_v45 = vpack.c.bf16 %v348_v42, %v341_v41  ;;  %v16500_v10 = vpack.c.bf16 %v1268_v5, %v1265_v4  ;;  %v14571_v41 = vld [vmem:[%s18916_s1 + $0x48] sm:$0xff]  ;;  %v14564_v5 = vld [vmem:[%s18917_s2 + $0x20] sm:$0xff] }
  0x34   : > { %v16480_v63 = vpack.c.bf16 %v855_v62, %v848_v61  ;;  %v1355_v11 = vsub.f32 %v1353_v6, %v1354_v8  ;;  %v1362_v12 = vsub.f32 %v1360_v7, %v1361_v9  ;;  %v16508_v16 = vpack.c.bf16 %v1360_v7, %v1353_v6 }
  0x35   : > { %v17739_v39 = vand.u32 4294901760, %v17733_v35  ;;  %v17742_v40 = vand.u32 4294901760, %v17736_v36  ;;  %16457 = vmatprep.subr.bf16.mxu0 %v16456_v45  ;;  %v16516_v17 = vpack.c.bf16 %v1361_v9, %v1354_v8  ;;  %v2789_v20 = vand.u32 4294901760, %v14566_v18 }
  0x36   : > { %v1356_v13 = vand.u32 4294901760, %v1355_v11  ;;  %v1363_v14 = vand.u32 4294901760, %v1362_v12  ;;  %v2792_v21 = vand.u32 4294901760, %v14567_v19  ;;  %v4313_v42 = vand.u32 4294901760, %v14570_v38 }
  0x37   : > { %v319_v43 = vsub.f32 %v17733_v35, %v17739_v39  ;;  %v329_v44 = vsub.f32 %v17736_v36, %v17742_v40  ;;  %v2877_v22 = vsub.f32 %v14566_v18, %v2789_v20  ;;  %v5334_v61 = vand.u32 4294901760, %v14575_v59  ;;  %v14579_v18 = vld [vmem:[%s18916_s1 + $0x68] sm:$0xff] }
  0x38   : > { %v16504_v15 = vpack.c.bf16 %v1363_v14, %v1356_v13  ;;  %v2884_v23 = vsub.f32 %v14567_v19, %v2792_v21  ;;  %v1770_v6 = vsel %vm226_vm1, %v14564_v5, 0 }
  0x39   : > { %v17748_v46 = vand.u32 4294901760, %v319_v43  ;;  %v17750_v47 = vand.u32 4294901760, %v329_v44  ;;  %v2878_v24 = vand.u32 4294901760, %v2877_v22  ;;  %v4316_v43 = vand.u32 4294901760, %v14571_v41 }
  0x3a   : > { %v2885_v25 = vand.u32 4294901760, %v2884_v23  ;;  %v16580_v34 = vpack.c.bf16 %v2884_v23, %v2877_v22  ;;  %v4401_v44 = vsub.f32 %v14570_v38, %v4313_v42  ;;  %v17845_v9 = vand.u32 4294901760, %v1770_v6 }
  0x3b   : > { %15280 = vmatprep.mubr.f32.mxu0 %v17748_v46  ;;  %v2879_v27 = vsub.f32 %v2877_v22, %v2878_v24  ;;  %v16644_v50 = vpack.c.bf16 %v4316_v43, %v4313_v42 }
  0x3c   : > { %15281 = vmatmul.mubr.f32.vlgmr.msra.gmra.mrb[0].mxu0 %v17750_v47  ;;  %v2886_v28 = vsub.f32 %v2884_v23, %v2885_v25  ;;  %v16588_v37 = vpack.c.bf16 %v2885_v25, %v2878_v24 }
  0x3d   : > { %16459 = vmatpush3.bf16.msra.mxu0 %v16456_v45  ;;  %15287 = vmatprep.mubr.f32.mxu0 %v17727_v30  ;;  %v2880_v29 = vand.u32 4294901760, %v2879_v27  ;;  %v4408_v45 = vsub.f32 %v14571_v41, %v4316_v43 }
  0x3e   : > { %16461 = vmatprep.subr.bf16.mxu0 %v16460_v48  ;;  %v2887_v31 = vand.u32 4294901760, %v2886_v28 }
  0x3f   : > { %v16652_v56 = vpack.c.bf16 %v4408_v45, %v4401_v44 }
  0x40   : > { %v16576_v33 = vpack.c.bf16 %v2887_v31, %v2880_v29 }
  0x44   : > { %15288 = vmatmul.mubr.f32.vlgmr.msra.gmra.mrb[0].mxu0 %v17730_v32 }
  0x45   : > { %16463 = vmatpush3.bf16.msra.mxu0 %v16460_v48  ;;  %15294 = vmatprep.mubr.f32.mxu0 %v17733_v35  ;;  %v4402_v48 = vand.u32 4294901760, %v4401_v44 }
  0x46   : > { %16465 = vmatprep.subr.bf16.mxu0 %v16452_v26 }
  0x47   : > { %v4403_v51 = vsub.f32 %v4401_v44, %v4402_v48 }
  0x49   : > { %v4404_v53 = vand.u32 4294901760, %v4403_v51 }
  0x4c   : > { %15295 = vmatmul.mubr.f32.vlgmr.msra.gmra.mrb[0].mxu0 %v17736_v36 }
  0x4d   : > { %16467 = vmatpush3.bf16.msra.mxu0 %v16452_v26  ;;  %15301 = vmatprep.mubr.f32.mxu0 %v17739_v39 }
  0x4e   : > { %16469 = vmatprep.subr.bf16.mxu0 %v16468_v49 }
  0x54   : > { %15302 = vmatmul.mubr.f32.vlgmr.msra.gmra.mrb[0].mxu0 %v17742_v40 }
  0x55   : > { %16471 = vmatpush3.bf16.msra.mxu0 %v16468_v49  ;;  %15308 = vmatprep.mubr.f32.mxu0 %v17727_v30  ;;  %v4409_v49 = vand.u32 4294901760, %v4408_v45 }
  0x56   : > { %16473 = vmatprep.subr.bf16.mxu0 %v16452_v26 }
  0x57   : > { %v4410_v52 = vsub.f32 %v4408_v45, %v4409_v49  ;;  %v16660_v57 = vpack.c.bf16 %v4409_v49, %v4402_v48 }
  0x59   : > { %v4411_v54 = vand.u32 4294901760, %v4410_v52 }
  0x5b   : > { %v16648_v55 = vpack.c.bf16 %v4411_v54, %v4404_v53 }
  0x5c   : > { %15309 = vmatmul.mubr.f32.vlgmr.msra.gmra.mrb[0].mxu0 %v17730_v32 }
  0x5d   : > { %16475 = vmatpush3.bf16.msra.mxu0 %v16452_v26  ;;  %15315 = vmatprep.mubr.f32.mxu0 %v17727_v30  ;;  %v16572_v26 = vpack.c.bf16 %v2792_v21, %v2789_v20  ;;  %v6352_v20 = vand.u32 4294901760, %v14579_v18 }
  0x5e   : > { %16477 = vmatprep.subr.bf16.mxu0 %v16476_v58 }
  0x5f   : > { %v6444_v22 = vsub.f32 %v14579_v18, %v6352_v20 }
  0x61   : > { %v6445_v24 = vand.u32 4294901760, %v6444_v22 }
  0x63   : > { %v6446_v27 = vsub.f32 %v6444_v22, %v6445_v24 }
  0x64   : > { %15316 = vmatmul.mubr.f32.vlgmr.msra.gmra.mrb[0].mxu0 %v17730_v32 }
  0x65   : > { %16479 = vmatpush3.bf16.msra.mxu0 %v16476_v58  ;;  %15322 = vmatprep.mubr.f32.mxu0 %v17748_v46  ;;  %v6447_v38 = vand.u32 4294901760, %v6446_v27 }
  0x66   : > { %16481 = vmatprep.subr.bf16.mxu0 %v16480_v63 }
  0x68   : > { %15323 = vmatmul.mubr.f32.vlgmr.msra.gmra.mrb[2].mxu0 %v17750_v47 }
  0x69   : > { %16483 = vmatpush3.bf16.msra.mxu0 %v16480_v63  ;;  %15329 = vmatprep.mubr.f32.mxu0 %v17727_v30  ;;  %v5426_v63 = vsub.f32 %v14575_v59, %v5334_v61 }
  0x6a   : > { %16485 = vmatprep.subr.bf16.mxu0 %v16484_v0 }
  0x70   : > { %15330 = vmatmul.mubr.f32.vlgmr.msra.gmra.mrb[2].mxu0 %v17730_v32 }
  0x71   : > { %16487 = vmatpush3.bf16.msra.mxu0 %v16484_v0  ;;  %15336 = vmatprep.mubr.f32.mxu0 %v17733_v35 }
  0x72   : > { %16489 = vmatprep.subr.bf16.mxu0 %v16476_v58 }
  0x78   : > { %15337 = vmatmul.mubr.f32.vlgmr.msra.gmra.mrb[2].mxu0 %v17736_v36 }
  0x79   : > { %16491 = vmatpush3.bf16.msra.mxu0 %v16476_v58  ;;  %15343 = vmatprep.mubr.f32.mxu0 %v17739_v39 }
  0x7a   : > { %16493 = vmatprep.subr.bf16.mxu0 %v16492_v1 }
  0x80   : > { %15344 = vmatmul.mubr.f32.vlgmr.msra.gmra.mrb[2].mxu0 %v17742_v40 }
  0x81   : > { %16495 = vmatpush3.bf16.msra.mxu0 %v16492_v1  ;;  %15350 = vmatprep.mubr.f32.mxu0 %v17727_v30  ;;  %v5427_v1 = vand.u32 4294901760, %v5426_v63 }
  0x82   : > { %16497 = vmatprep.subr.bf16.mxu0 %v16476_v58 }
  0x83   : > { %v5428_v4 = vsub.f32 %v5426_v63, %v5427_v1 }
  0x85   : > { %v5429_v8 = vand.u32 4294901760, %v5428_v4 }
  0x88   : > { %15351 = vmatmul.mubr.f32.vlgmr.msra.gmra.mrb[2].mxu0 %v17730_v32 }
  0x89   : > { %16499 = vmatpush3.bf16.msra.mxu0 %v16476_v58  ;;  %15357 = vmatprep.mubr.f32.mxu0 %v17727_v30  ;;  %v14574_v58 = vld [vmem:[%s18916_s1 + $0x50] sm:$0xff] }
  0x8a   : > { %16501 = vmatprep.subr.bf16.mxu0 %v16500_v10  ;;  %v5331_v60 = vand.u32 4294901760, %v14574_v58 }
  0x8c   : > { %v5419_v62 = vsub.f32 %v14574_v58, %v5331_v60  ;;  %v16692_v2 = vpack.c.bf16 %v5334_v61, %v5331_v60  ;;  %v240_v60 = vld [vmem:[#allocation3 + $0x8] sm:$0xff] }
  0x8e   : > { %v5420_v0 = vand.u32 4294901760, %v5419_v62  ;;  %v16700_v14 = vpack.c.bf16 %v5426_v63, %v5419_v62 }
  0x90   : > { %15358 = vmatmul.mubr.f32.vlgmr.msra.gmra.mrb[2].mxu0 %v17730_v32  ;;  %v5421_v3 = vsub.f32 %v5419_v62, %v5420_v0  ;;  %v7370_v62 = vsel %vm226_vm1, %v240_v60, 0 }
  0x91   : > { %16503 = vmatpush3.bf16.msra.mxu0 %v16500_v10  ;;  %15364 = vmatprep.mubr.f32.mxu0 %v17748_v46 }
  0x92   : > { %16505 = vmatprep.subr.bf16.mxu0 %v16504_v15  ;;  %v5422_v7 = vand.u32 4294901760, %v5421_v3 }
  0x94   : > { %15365 = vmatmul.mubr.f32.vlgmr.msra.gmra.mrb[4].mxu0 %v17750_v47  ;;  %v16696_v11 = vpack.c.bf16 %v5429_v8, %v5422_v7 }
  0x95   : > { %16507 = vmatpush3.bf16.msra.mxu0 %v16504_v15  ;;  %15371 = vmatprep.mubr.f32.mxu0 %v17727_v30 }
  0x96   : > { %16509 = vmatprep.subr.bf16.mxu0 %v16508_v16 }
  0x9c   : > { %15372 = vmatmul.mubr.f32.vlgmr.msra.gmra.mrb[4].mxu0 %v17730_v32 }
  0x9d   : > { %16511 = vmatpush3.bf16.msra.mxu0 %v16508_v16  ;;  %15378 = vmatprep.mubr.f32.mxu0 %v17733_v35  ;;  %v16708_v16 = vpack.c.bf16 %v5427_v1, %v5420_v0  ;;  %v17909_v1 = vand.u32 4294901760, %v7370_v62 }
  0x9e   : > { %16513 = vmatprep.subr.bf16.mxu0 %v16500_v10 }
  0x9f   : > { %v17917_v3 = vsub.f32 %v7370_v62, %v17909_v1 }
  0xa4   : > { %15379 = vmatmul.mubr.f32.vlgmr.msra.gmra.mrb[4].mxu0 %v17736_v36 }
  0xa5   : > { %16515 = vmatpush3.bf16.msra.mxu0 %v16500_v10  ;;  %15385 = vmatprep.mubr.f32.mxu0 %v17739_v39 }
  0xa6   : > { %16517 = vmatprep.subr.bf16.mxu0 %v16516_v17 }
  0xac   : > { %15386 = vmatmul.mubr.f32.vlgmr.msra.gmra.mrb[4].mxu0 %v17742_v40 }
  0xad   : > { %16519 = vmatpush3.bf16.msra.mxu0 %v16516_v17  ;;  %15392 = vmatprep.mubr.f32.mxu0 %v17727_v30  ;;  %v14578_v17 = vld [vmem:[%s18916_s1 + $0x60] sm:$0xff] }
  0xae   : > { %16521 = vmatprep.subr.bf16.mxu0 %v16500_v10  ;;  %v6349_v19 = vand.u32 4294901760, %v14578_v17 }
  0xb0   : > { %v6437_v21 = vsub.f32 %v14578_v17, %v6349_v19  ;;  %v17874_v25 = vpack.c.bf16 %v6352_v20, %v6349_v19 }
  0xb2   : > { %v6438_v23 = vand.u32 4294901760, %v6437_v21  ;;  %v16748_v54 = vpack.c.bf16 %v6444_v22, %v6437_v21 }
  0xb4   : > { %15393 = vmatmul.mubr.f32.vlgmr.msra.gmra.mrb[4].mxu0 %v17730_v32 }
  0xb5   : > { %16523 = vmatpush3.bf16.msra.mxu0 %v16500_v10  ;;  %15399 = vmatprep.mubr.f32.mxu0 %v17727_v30  ;;  %v17848_v10 = vsub.f32 %v1770_v6, %v17845_v9 }
  0xb6   : > { %16573 = vmatprep.subr.bf16.mxu0 %v16572_v26 }
  0xb7   : > { %v17851_v12 = vand.u32 4294901760, %v17848_v10 }
  0xb9   : > { %18945 = vst [vmem:[#allocation7_spill] sm:$0xff] %v17851_v12  ;;  %v1845_v13 = vsub.f32 %v17848_v10, %v17851_v12 }
  0xbb   : > { %v17857_v15 = vand.u32 4294901760, %v1845_v13  ;;  %v17926_v13 = vand.u32 4294901760, %v17917_v3 }
  0xbc   : > { %15400 = vmatmul.mubr.f32.vlgmr.msra.gmra.mrb[4].mxu0 %v17730_v32 }
  0xbd   : > { %16575 = vmatpush3.bf16.msra.mxu0 %v16572_v26  ;;  %15490 = vmatprep.mubr.f32.mxu0 %v17748_v46 }
  0xbe   : > { %16577 = vmatprep.subr.bf16.mxu0 %v16576_v33  ;;  %15406 = vmatprep.mubr.f32.mxu1 %v17857_v15 }
  0xc0   : > { %15491 = vmatmul.mubr.f32.vlgmr.msra.gmra.mrb[6].mxu0 %v17750_v47 }
  0xc1   : > { %16579 = vmatpush3.bf16.msra.mxu0 %v16576_v33  ;;  %15497 = vmatprep.mubr.f32.mxu0 %v17727_v30 }
  0xc2   : > { %16581 = vmatprep.subr.bf16.mxu0 %v16580_v34 }
  0xc8   : > { %15498 = vmatmul.mubr.f32.vlgmr.msra.gmra.mrb[6].mxu0 %v17730_v32 }
  0xc9   : > { %16583 = vmatpush3.bf16.msra.mxu0 %v16580_v34  ;;  %15504 = vmatprep.mubr.f32.mxu0 %v17733_v35 }
  0xca   : > { %16585 = vmatprep.subr.bf16.mxu0 %v16572_v26 }
  0xd0   : > { %15505 = vmatmul.mubr.f32.vlgmr.msra.gmra.mrb[6].mxu0 %v17736_v36 }
  0xd1   : > { %16587 = vmatpush3.bf16.msra.mxu0 %v16572_v26  ;;  %15511 = vmatprep.mubr.f32.mxu0 %v17739_v39 }
  0xd2   : > { %16589 = vmatprep.subr.bf16.mxu0 %v16588_v37 }
  0xd8   : > { %15512 = vmatmul.mubr.f32.vlgmr.msra.gmra.mrb[6].mxu0 %v17742_v40 }
  0xd9   : > { %16591 = vmatpush3.bf16.msra.mxu0 %v16588_v37  ;;  %15518 = vmatprep.mubr.f32.mxu0 %v17727_v30 }
  0xda   : > { %16593 = vmatprep.subr.bf16.mxu0 %v16572_v26 }
  0xe0   : > { %15519 = vmatmul.mubr.f32.vlgmr.msra.gmra.mrb[6].mxu0 %v17730_v32 }
  0xe1   : > { %16595 = vmatpush3.bf16.msra.mxu0 %v16572_v26  ;;  %15525 = vmatprep.mubr.f32.mxu0 %v17727_v30  ;;  %v6439_v26 = vsub.f32 %v6437_v21, %v6438_v23 }
  0xe2   : > { %16645 = vmatprep.subr.bf16.mxu0 %v16644_v50 }
  0xe3   : > { %v6440_v37 = vand.u32 4294901760, %v6439_v26 }
  0xe5   : > { %v16744_v49 = vpack.c.bf16 %v6447_v38, %v6440_v37 }
  0xe8   : > { %15526 = vmatmul.mubr.f32.vlgmr.msra.gmra.mrb[6].mxu0 %v17730_v32 }
  0xe9   : > { %16647 = vmatpush3.bf16.msra.mxu0 %v16644_v50  ;;  %15616 = vmatprep.mubr.f32.mxu0 %v17748_v46 }
  0xea   : > { %16649 = vmatprep.subr.bf16.mxu0 %v16648_v55 }
  0xec   : > { %15617 = vmatmul.mubr.f32.vlgmr.msra.gmra.mrb[8].mxu0 %v17750_v47 }
  0xed   : > { %16651 = vmatpush3.bf16.msra.mxu0 %v16648_v55  ;;  %15623 = vmatprep.mubr.f32.mxu0 %v17727_v30 }
  0xee   : > { %16653 = vmatprep.subr.bf16.mxu0 %v16652_v56 }
  0xf4   : > { %15624 = vmatmul.mubr.f32.vlgmr.msra.gmra.mrb[8].mxu0 %v17730_v32 }
  0xf5   : > { %16655 = vmatpush3.bf16.msra.mxu0 %v16652_v56  ;;  %15630 = vmatprep.mubr.f32.mxu0 %v17733_v35  ;;  %v16756_v56 = vpack.c.bf16 %v6445_v24, %v6438_v23  ;;  %v7452_v23 = vsub.f32 %v17917_v3, %v17926_v13 }
  0xf6   : > { %16657 = vmatprep.subr.bf16.mxu0 %v16644_v50 }
  0xfc   : > { %15631 = vmatmul.mubr.f32.vlgmr.msra.gmra.mrb[8].mxu0 %v17736_v36 }
  0xfd   : > { %16659 = vmatpush3.bf16.msra.mxu0 %v16644_v50  ;;  %15637 = vmatprep.mubr.f32.mxu0 %v17739_v39 }
  0xfe   : > { %16661 = vmatprep.subr.bf16.mxu0 %v16660_v57 }
 0x104   : > { %15638 = vmatmul.mubr.f32.vlgmr.msra.gmra.mrb[8].mxu0 %v17742_v40 }
 0x105   : > { %16663 = vmatpush3.bf16.msra.mxu0 %v16660_v57  ;;  %15644 = vmatprep.mubr.f32.mxu0 %v17727_v30  ;;  %v239_v57 = vld [vmem:[#allocation3] sm:$0xff] }
 0x106   : > { %16665 = vmatprep.subr.bf16.mxu0 %v16644_v50  ;;  %v7367_v59 = vsel %vm226_vm1, %v239_v57, 0 }
 0x107   : > { %v17905_v61 = vand.u32 4294901760, %v7367_v59 }
 0x10c   : > { %15645 = vmatmul.mubr.f32.vlgmr.msra.gmra.mrb[8].mxu0 %v17730_v32 }
 0x10d   : > { %16667 = vmatpush3.bf16.msra.mxu0 %v16644_v50  ;;  %15651 = vmatprep.mubr.f32.mxu0 %v17727_v30 }
 0x10e   : > { %16693 = vmatprep.subr.bf16.mxu0 %v16692_v2 }
 0x114   : > { %15652 = vmatmul.mubr.f32.vlgmr.msra.gmra.mrb[8].mxu0 %v17730_v32 }
 0x115   : > { %16695 = vmatpush3.bf16.msra.mxu0 %v16692_v2  ;;  %15700 = vmatprep.mubr.f32.mxu0 %v17748_v46 }
 0x116   : > { %16697 = vmatprep.subr.bf16.mxu0 %v16696_v11 }
 0x118   : > { %15701 = vmatmul.mubr.f32.vlgmr.msra.gmra.mrb[10].mxu0 %v17750_v47 }
 0x119   : > { %16699 = vmatpush3.bf16.msra.mxu0 %v16696_v11  ;;  %15707 = vmatprep.mubr.f32.mxu0 %v17727_v30 }
 0x11a   : > { %16701 = vmatprep.subr.bf16.mxu0 %v16700_v14 }
 0x120   : > { %15708 = vmatmul.mubr.f32.vlgmr.msra.gmra.mrb[10].mxu0 %v17730_v32 }
 0x121   : > { %16703 = vmatpush3.bf16.msra.mxu0 %v16700_v14  ;;  %15714 = vmatprep.mubr.f32.mxu0 %v17733_v35 }
 0x122   : > { %16705 = vmatprep.subr.bf16.mxu0 %v16692_v2 }
 0x128   : > { %15715 = vmatmul.mubr.f32.vlgmr.msra.gmra.mrb[10].mxu0 %v17736_v36 }
 0x129   : > { %16707 = vmatpush3.bf16.msra.mxu0 %v16692_v2  ;;  %15721 = vmatprep.mubr.f32.mxu0 %v17739_v39 }
 0x12a   : > { %16709 = vmatprep.subr.bf16.mxu0 %v16708_v16 }
 0x130   : > { %15722 = vmatmul.mubr.f32.vlgmr.msra.gmra.mrb[10].mxu0 %v17742_v40 }
 0x131   : > { %16711 = vmatpush3.bf16.msra.mxu0 %v16708_v16  ;;  %15728 = vmatprep.mubr.f32.mxu0 %v17727_v30 }
 0x132   : > { %16713 = vmatprep.subr.bf16.mxu0 %v16692_v2 }
 0x137   : > { %v15317_v28 = vpop.f32.mrb[0].mxu0 }
 0x138   : > { %v2287_v29 = vand.u32 4294901760, %v15317_v28  ;;  %v741_v31 = vpop.f32.mrb[1].mxu0  ;;  %15729 = vmatmul.mubr.f32.vlgmr.msra.gmra.mrb[10].mxu0 %v17730_v32 }
 0x139   : > { %v2284_v33 = vand.u32 4294901760, %v741_v31  ;;  %16715 = vmatpush3.bf16.msra.mxu0 %v16692_v2  ;;  %15735 = vmatprep.mubr.f32.mxu0 %v17727_v30 }
 0x13a   : > { %v2379_v34 = vsub.f32 %v15317_v28, %v2287_v29  ;;  %16741 = vmatprep.subr.bf16.mxu0 %v17874_v25 }
 0x13b   : > { %v17879_v41 = vpack.c.bf16 %v2287_v29, %v2284_v33  ;;  %v2372_v42 = vsub.f32 %v741_v31, %v2284_v33  ;;  %v17944_v31 = vand.u32 4294901760, %v7452_v23 }
 0x13c   : > { %v2380_v43 = vand.u32 4294901760, %v2379_v34 }
 0x13d   : > { %v2373_v44 = vand.u32 4294901760, %v2372_v42  ;;  %v17881_v45 = vpack.c.bf16 %v2379_v34, %v2372_v42 }
 0x13e   : > { %v2381_v48 = vsub.f32 %v2379_v34, %v2380_v43 }
 0x13f   : > { %v2374_v50 = vsub.f32 %v2372_v42, %v2373_v44  ;;  %v17883_v51 = vpack.c.bf16 %v2380_v43, %v2373_v44  ;;  %v14565_v42 = vld [vmem:[%s18917_s2 + $0x28] sm:$0xff]  ;;  %v14584_v43 = vld [vmem:[%s18916_s1 + $0x80] sm:$0xff] }
 0x140   : > { %15736 = vmatmul.mubr.f32.vlgmr.msra.gmra.mrb[10].mxu0 %v17730_v32  ;;  %v2382_v52 = vand.u32 4294901760, %v2381_v48  ;;  %v14585_v44 = vld [vmem:[%s18916_s1 + $0x88] sm:$0xff]  ;;  %v1773_v48 = vsel %vm226_vm1, %v14565_v42, 0 }
 0x141   : > { %16743 = vmatpush3.bf16.msra.mxu0 %v17874_v25  ;;  %15784 = vmatprep.mubr.f32.mxu0 %v17748_v46  ;;  %v2375_v53 = vand.u32 4294901760, %v2374_v50  ;;  %v14582_v46 = vld [vmem:[%s18916_s1 + $0x70] sm:$0xff]  ;;  %v8385_v50 = vand.u32 4294901760, %v14585_v44 }
 0x142   : > { %16745 = vmatprep.subr.bf16.mxu0 %v16744_v49 }
 0x143   : > { %v17888_v55 = vpack.c.bf16 %v2382_v52, %v2375_v53  ;;  %v17968_v52 = vand.u32 4294901760, %v1773_v48 }
 0x144   : > { %15785 = vmatmul.mubr.f32.vlgmr.msra.gmra.mrb[12].mxu0 %v17750_v47  ;;  %v14583_v47 = vld [vmem:[%s18916_s1 + $0x78] sm:$0xff] }
 0x145   : > { %16747 = vmatpush3.bf16.msra.mxu0 %v16744_v49  ;;  %15791 = vmatprep.mubr.f32.mxu0 %v17727_v30  ;;  %v7376_v58 = vand.u32 4294901760, %v14583_v47  ;;  %v8382_v49 = vand.u32 4294901760, %v14584_v43 }
 0x146   : > { %16749 = vmatprep.subr.bf16.mxu0 %v16748_v54 }
 0x147   : > { %v7468_v0 = vsub.f32 %v14583_v47, %v7376_v58  ;;  %v17970_v53 = vsub.f32 %v14584_v43, %v8382_v49 }
 0x149   : > { %v7469_v2 = vand.u32 4294901760, %v7468_v0 }
 0x14b   : > { %v7470_v6 = vsub.f32 %v7468_v0, %v7469_v2 }
 0x14c   : > { %15792 = vmatmul.mubr.f32.vlgmr.msra.gmra.mrb[12].mxu0 %v17730_v32 }
 0x14d   : > { %16751 = vmatpush3.bf16.msra.mxu0 %v16748_v54  ;;  %15798 = vmatprep.mubr.f32.mxu0 %v17733_v35  ;;  %v7373_v35 = vand.u32 4294901760, %v14582_v46  ;;  %v7471_v19 = vand.u32 4294901760, %v7470_v6  ;;  %v17972_v54 = vsub.f32 %v14585_v44, %v8385_v50  ;;  %v752_v44 = vld [vmem:[%s18917_s2 + $0x8] sm:$0xff] }
 0x14e   : > { %16753 = vmatprep.subr.bf16.mxu0 %v17874_v25 }
 0x14f   : > { %v7461_v63 = vsub.f32 %v14582_v46, %v7373_v35  ;;  %v17922_v5 = vpack.c.bf16 %v7376_v58, %v7373_v35  ;;  %v8471_v46 = vand.u32 4294901760, %v17970_v53  ;;  %v8478_v47 = vand.u32 4294901760, %v17972_v54 }
 0x150   : > { %v17985_v35 = vpack.c.bf16 %v8385_v50, %v8382_v49  ;;  %v2281_v49 = vsel %vm226_vm1, %v752_v44, 0  ;;  %v14589_v44 = vld [vmem:[%s18916_s1 + $0xa8] sm:$0xff] }
 0x151   : > { %v16796_v37 = vpack.c.bf16 %v7468_v0, %v7461_v63  ;;  %v8479_v60 = vsub.f32 %v17972_v54, %v8478_v47 }
 0x154   : > { %15799 = vmatmul.mubr.f32.vlgmr.msra.gmra.mrb[12].mxu0 %v17736_v36  ;;  %v17913_v36 = vsub.f32 %v7367_v59, %v17905_v61  ;;  %v8472_v59 = vsub.f32 %v17970_v53, %v8471_v46 }
 0x155   : > { %16755 = vmatpush3.bf16.msra.mxu0 %v17874_v25  ;;  %15805 = vmatprep.mubr.f32.mxu0 %v17739_v39  ;;  %v7462_v39 = vand.u32 4294901760, %v7461_v63 }
 0x156   : > { %16757 = vmatprep.subr.bf16.mxu0 %v16756_v56  ;;  %v17920_v4 = vand.u32 4294901760, %v17913_v36 }
 0x158   : > { %v7442_v16 = vsub.f32 %v17913_v36, %v17920_v4 }
 0x15a   : > { %v17937_v26 = vand.u32 4294901760, %v7442_v16 }
 0x15c   : > { %15806 = vmatmul.mubr.f32.vlgmr.msra.gmra.mrb[12].mxu0 %v17742_v40  ;;  %v7463_v40 = vsub.f32 %v7461_v63, %v7462_v39 }
 0x15d   : > { %16759 = vmatpush3.bf16.msra.mxu0 %v16756_v56  ;;  %15812 = vmatprep.mubr.f32.mxu0 %v17727_v30  ;;  %v17976_v56 = vsub.f32 %v1773_v48, %v17968_v52 }
 0x15e   : > { %16761 = vmatprep.subr.bf16.mxu0 %v17874_v25  ;;  %v7464_v18 = vand.u32 4294901760, %v7463_v40 }
 0x15f   : > { %v17983_v57 = vand.u32 4294901760, %v17976_v56 }
 0x160   : > { %v16792_v27 = vpack.c.bf16 %v7471_v19, %v7464_v18 }
 0x161   : > { %18946 = vst [vmem:[#allocation8_spill] sm:$0xff] %v17983_v57 }
 0x163   : > { %v15359_v7 = vpop.f32.mrb[2].mxu0 }
 0x164   : > { %v3811_v8 = vand.u32 4294901760, %v15359_v7  ;;  %v1248_v11 = vpop.f32.mrb[3].mxu0  ;;  %15813 = vmatmul.mubr.f32.vlgmr.msra.gmra.mrb[12].mxu0 %v17730_v32 }
 0x165   : > { %v3808_v14 = vand.u32 4294901760, %v1248_v11  ;;  %16763 = vmatpush3.bf16.msra.mxu0 %v17874_v25  ;;  %15819 = vmatprep.mubr.f32.mxu0 %v17727_v30 }
 0x166   : > { %v3903_v17 = vsub.f32 %v15359_v7, %v3811_v8  ;;  %16789 = vmatprep.subr.bf16.mxu0 %v17922_v5  ;;  %v8473_v7 = vand.u32 4294901760, %v8472_v59 }
 0x167   : > { %v17933_v20 = vpack.c.bf16 %v3811_v8, %v3808_v14  ;;  %v3896_v21 = vsub.f32 %v1248_v11, %v3808_v14  ;;  %v8480_v8 = vand.u32 4294901760, %v8479_v60 }
 0x168   : > { %v3904_v22 = vand.u32 4294901760, %v3903_v17 }
 0x169   : > { %v3897_v24 = vand.u32 4294901760, %v3896_v21  ;;  %v17939_v25 = vpack.c.bf16 %v3903_v17, %v3896_v21 }
 0x16a   : > { %v3905_v30 = vsub.f32 %v3903_v17, %v3904_v22 }
 0x16b   : > { %v3898_v28 = vsub.f32 %v3896_v21, %v3897_v24  ;;  %v17941_v29 = vpack.c.bf16 %v3904_v22, %v3897_v24  ;;  %v16840_v21 = vpack.c.bf16 %v8480_v8, %v8473_v7 }
 0x16c   : > { %15820 = vmatmul.mubr.f32.vlgmr.msra.gmra.mrb[12].mxu0 %v17730_v32  ;;  %v3906_v33 = vand.u32 4294901760, %v3905_v30  ;;  %v16804_v32 = vpack.c.bf16 %v7469_v2, %v7462_v39  ;;  %v1855_v39 = vsub.f32 %v17976_v56, %v17983_v57  ;;  %v16844_v30 = vpack.c.bf16 %v17972_v54, %v17970_v53 }
 0x16d   : > { %16791 = vmatpush3.bf16.msra.mxu0 %v17922_v5  ;;  %15868 = vmatprep.mubr.f32.mxu0 %v17937_v26  ;;  %v3899_v34 = vand.u32 4294901760, %v3898_v28 }
 0x16e   : > { %16793 = vmatprep.subr.bf16.mxu0 %v16792_v27  ;;  %v17998_v16 = vand.u32 4294901760, %v1855_v39 }
 0x16f   : > { %v17948_v38 = vpack.c.bf16 %v3906_v33, %v3899_v34  ;;  %v16852_v33 = vpack.c.bf16 %v8478_v47, %v8471_v46  ;;  %v14586_v34 = vld [vmem:[%s18916_s1 + $0x90] sm:$0xff]  ;;  %v18052_v46 = vand.u32 4294901760, %v2281_v49 }
 0x170   : > { %15869 = vmatmul.mubr.f32.vlgmr.msra.gmra.mrb[14].mxu0 %v17944_v31  ;;  %v9391_v42 = vand.u32 4294901760, %v14586_v34 }
 0x171   : > { %16795 = vmatpush3.bf16.msra.mxu0 %v16792_v27  ;;  %15875 = vmatprep.mubr.f32.mxu0 %v17905_v61  ;;  %v751_v27 = vld [vmem:[%s18917_s2] sm:$0xff]  ;;  %v18062_v60 = vsub.f32 %v2281_v49, %v18052_v46 }
 0x172   : > { %16797 = vmatprep.subr.bf16.mxu0 %v16796_v37  ;;  %v2278_v28 = vsel %vm226_vm1, %v751_v27, 0  ;;  %v18043_v50 = vsub.f32 %v14586_v34, %v9391_v42 }
 0x173   : > { %v18077_v7 = vand.u32 4294901760, %v18062_v60 }
 0x174   : > { %v9480_v47 = vand.u32 4294901760, %v18043_v50 }
 0x178   : > { %15876 = vmatmul.mubr.f32.vlgmr.msra.gmra.mrb[14].mxu0 %v17909_v1 }
 0x179   : > { %16799 = vmatpush3.bf16.msra.mxu0 %v16796_v37  ;;  %15882 = vmatprep.mubr.f32.mxu0 %v17913_v36  ;;  %v14587_v37 = vld [vmem:[%s18916_s1 + $0x98] sm:$0xff] }
 0x17a   : > { %16801 = vmatprep.subr.bf16.mxu0 %v17922_v5  ;;  %v9394_v43 = vand.u32 4294901760, %v14587_v37 }
 0x17c   : > { %v18045_v53 = vsub.f32 %v14587_v37, %v9394_v43 }
 0x180   : > { %15883 = vmatmul.mubr.f32.vlgmr.msra.gmra.mrb[14].mxu0 %v17917_v3 }
 0x181   : > { %16803 = vmatpush3.bf16.msra.mxu0 %v17922_v5  ;;  %15889 = vmatprep.mubr.f32.mxu0 %v17920_v4 }
 0x182   : > { %16805 = vmatprep.subr.bf16.mxu0 %v16804_v32 }
 0x188   : > { %15890 = vmatmul.mubr.f32.vlgmr.msra.gmra.mrb[14].mxu0 %v17926_v13 }
 0x189   : > { %16807 = vmatpush3.bf16.msra.mxu0 %v16804_v32  ;;  %15896 = vmatprep.mubr.f32.mxu0 %v17905_v61  ;;  %v18030_v32 = vand.u32 4294901760, %v2278_v28 }
 0x18a   : > { %16809 = vmatprep.subr.bf16.mxu0 %v17922_v5 }
 0x18b   : > { %v18039_v48 = vsub.f32 %v2278_v28, %v18030_v32 }
 0x18d   : > { %v18050_v54 = vand.u32 4294901760, %v18039_v48 }
 0x18f   : > { %v15401_v58 = vpop.f32.mrb[4].mxu0  ;;  %v2353_v59 = vsub.f32 %v18039_v48, %v18050_v54 }
 0x190   : > { %v1779_v62 = vand.u32 4294901760, %v15401_v58  ;;  %v1756_v63 = vpop.f32.mrb[5].mxu0  ;;  %15897 = vmatmul.mubr.f32.vlgmr.msra.gmra.mrb[14].mxu0 %v17909_v1 }
 0x191   : > { %v1776_v0 = vand.u32 4294901760, %v1756_v63  ;;  %16811 = vmatpush3.bf16.msra.mxu0 %v17922_v5  ;;  %15903 = vmatprep.mubr.f32.mxu0 %v17905_v61 }
 0x192   : > { %v1871_v2 = vsub.f32 %v15401_v58, %v1779_v62  ;;  %16837 = vmatprep.subr.bf16.mxu0 %v17985_v35  ;;  %v9487_v58 = vand.u32 4294901760, %v18045_v53 }
 0x193   : > { %v17995_v40 = vpack.c.bf16 %v1779_v62, %v1776_v0  ;;  %v1864_v6 = vsub.f32 %v1756_v63, %v1776_v0  ;;  %v18066_v62 = vpack.c.bf16 %v9394_v43, %v9391_v42  ;;  %v9481_v63 = vsub.f32 %v18043_v50, %v9480_v47 }
 0x194   : > { %v1872_v11 = vand.u32 4294901760, %v1871_v2  ;;  %v9488_v0 = vsub.f32 %v18045_v53, %v9487_v58  ;;  %v16892_v42 = vpack.c.bf16 %v18045_v53, %v18043_v50  ;;  %v16900_v43 = vpack.c.bf16 %v9487_v58, %v9480_v47  ;;  %v14569_v58 = vld [vmem:[%s18917_s2 + $0x38] sm:$0xff] }
 0x195   : > { %v1865_v14 = vand.u32 4294901760, %v1864_v6  ;;  %16525 = vmatprep.subr.bf16.mxu1 %v17995_v40  ;;  %v16532_v17 = vpack.c.bf16 %v1871_v2, %v1864_v6  ;;  %v10403_v53 = vand.u32 4294901760, %v14589_v44 }
 0x196   : > { %v1873_v18 = vsub.f32 %v1871_v2, %v1872_v11  ;;  %16527 = vmatpush3.bf16.msra.mxu1 %v17995_v40 }
 0x197   : > { %v1866_v5 = vsub.f32 %v1864_v6, %v1865_v14  ;;  %v16540_v19 = vpack.c.bf16 %v1872_v11, %v1865_v14  ;;  %v18081_v11 = vand.u32 4294901760, %v2353_v59  ;;  %v9482_v14 = vand.u32 4294901760, %v9481_v63 }
 0x198   : > { %v1874_v22 = vand.u32 4294901760, %v1873_v18  ;;  %15904 = vmatmul.mubr.f32.vlgmr.msra.gmra.mrb[14].mxu0 %v17909_v1  ;;  %v18147_v63 = vsub.f32 %v14589_v44, %v10403_v53 }
 0x199   : > { %15407 = vmatmul.mubr.f32.vlgmr.msra.gmra.mrb[0].mxu1 %v17998_v16  ;;  %v1867_v23 = vand.u32 4294901760, %v1866_v5  ;;  %16839 = vmatpush3.bf16.msra.mxu0 %v17985_v35 }
 0x19a   : > { %15413 = vmatprep.mubr.f32.mxu1 %v17845_v9  ;;  %15952 = vmatprep.mubr.f32.mxu0 %v17937_v26 }
 0x19b   : > { %v16528_v24 = vpack.c.bf16 %v1874_v22, %v1867_v23  ;;  %16841 = vmatprep.subr.bf16.mxu0 %v16840_v21  ;;  %v2363_v22 = vsub.f32 %v18062_v60, %v18077_v7 }
 0x19c   : > { %15953 = vmatmul.mubr.f32.vlgmr.msra.gmra.mrb[16].mxu0 %v17944_v31 }
 0x19d   : > { %16529 = vmatprep.subr.bf16.mxu1 %v16528_v24  ;;  %16843 = vmatpush3.bf16.msra.mxu0 %v16840_v21 }
 0x19e   : > { %16531 = vmatpush3.bf16.msra.mxu1 %v16528_v24  ;;  %15959 = vmatprep.mubr.f32.mxu0 %v17905_v61 }
 0x19f   : > { %16533 = vmatprep.subr.bf16.mxu1 %v16532_v17  ;;  %16845 = vmatprep.subr.bf16.mxu0 %v16844_v30 }
 0x1a1   : > { %15414 = vmatmul.mubr.f32.vlgmr.msra.gmra.mrb[0].mxu1 %v17968_v52 }
 0x1a2   : > { %16535 = vmatpush3.bf16.msra.mxu1 %v16532_v17  ;;  %15420 = vmatprep.mubr.f32.mxu1 %v17848_v10  ;;  %v9489_v17 = vand.u32 4294901760, %v9488_v0 }
 0x1a3   : > { %16537 = vmatprep.subr.bf16.mxu1 %v17995_v40 }
 0x1a4   : > { %15960 = vmatmul.mubr.f32.vlgmr.msra.gmra.mrb[16].mxu0 %v17909_v1  ;;  %v16888_v24 = vpack.c.bf16 %v9489_v17, %v9482_v14 }
 0x1a5   : > { %16847 = vmatpush3.bf16.msra.mxu0 %v16844_v30  ;;  %15966 = vmatprep.mubr.f32.mxu0 %v17913_v36 }
 0x1a6   : > { %16849 = vmatprep.subr.bf16.mxu0 %v17985_v35 }
 0x1a9   : > { %15421 = vmatmul.mubr.f32.vlgmr.msra.gmra.mrb[0].mxu1 %v17976_v56 }
 0x1aa   : > { %16539 = vmatpush3.bf16.msra.mxu1 %v17995_v40  ;;  %15427 = vmatprep.mubr.f32.mxu1 %v17851_v12 }
 0x1ab   : > { %16541 = vmatprep.subr.bf16.mxu1 %v16540_v19 }
 0x1ac   : > { %15967 = vmatmul.mubr.f32.vlgmr.msra.gmra.mrb[16].mxu0 %v17917_v3 }
 0x1ad   : > { %16851 = vmatpush3.bf16.msra.mxu0 %v17985_v35  ;;  %15973 = vmatprep.mubr.f32.mxu0 %v17920_v4 }
 0x1ae   : > { %16853 = vmatprep.subr.bf16.mxu0 %v16852_v33 }
 0x1b1   : > { %15428 = vmatmul.mubr.f32.vlgmr.msra.gmra.mrb[0].mxu1 %v17983_v57 }
 0x1b2   : > { %16543 = vmatpush3.bf16.msra.mxu1 %v16540_v19  ;;  %15434 = vmatprep.mubr.f32.mxu1 %v17845_v9 }
 0x1b3   : > { %16545 = vmatprep.subr.bf16.mxu1 %v17995_v40 }
 0x1b4   : > { %15974 = vmatmul.mubr.f32.vlgmr.msra.gmra.mrb[16].mxu0 %v17926_v13 }
 0x1b5   : > { %16855 = vmatpush3.bf16.msra.mxu0 %v16852_v33  ;;  %15980 = vmatprep.mubr.f32.mxu0 %v17905_v61  ;;  %v18097_v33 = vand.u32 4294901760, %v2363_v22 }
 0x1b6   : > { %16857 = vmatprep.subr.bf16.mxu0 %v17985_v35 }
 0x1b9   : > { %15435 = vmatmul.mubr.f32.vlgmr.msra.gmra.mrb[0].mxu1 %v17968_v52 }
 0x1ba   : > { %16547 = vmatpush3.bf16.msra.mxu1 %v17995_v40  ;;  %15441 = vmatprep.mubr.f32.mxu1 %v17845_v9 }
 0x1bb   : > { %16549 = vmatprep.subr.bf16.mxu1 %v17879_v41  ;;  %v15527_v39 = vpop.f32.mrb[6].mxu0 }
 0x1bc   : > { %v3303_v2 = vand.u32 4294901760, %v15527_v39  ;;  %v3280_v6 = vpop.f32.mrb[7].mxu0  ;;  %15981 = vmatmul.mubr.f32.vlgmr.msra.gmra.mrb[16].mxu0 %v17909_v1 }
 0x1bd   : > { %v3300_v40 = vand.u32 4294901760, %v3280_v6  ;;  %16859 = vmatpush3.bf16.msra.mxu0 %v17985_v35  ;;  %15987 = vmatprep.mubr.f32.mxu0 %v17905_v61 }
 0x1be   : > { %v3395_v8 = vsub.f32 %v15527_v39, %v3303_v2  ;;  %16885 = vmatprep.subr.bf16.mxu0 %v18066_v62  ;;  %v3297_v39 = vsel %vm226_vm1, %v14569_v58, 0 }
 0x1bf   : > { %v18084_v18 = vpack.c.bf16 %v3303_v2, %v3300_v40  ;;  %v3388_v5 = vsub.f32 %v3280_v6, %v3300_v40  ;;  %v10496_v6 = vand.u32 4294901760, %v18147_v63  ;;  %v18161_v40 = vand.u32 4294901760, %v3297_v39 }
 0x1c0   : > { %v3396_v19 = vand.u32 4294901760, %v3395_v8 }
 0x1c1   : > { %15442 = vmatmul.mubr.f32.vlgmr.msra.gmra.mrb[0].mxu1 %v17968_v52  ;;  %v3389_v21 = vand.u32 4294901760, %v3388_v5  ;;  %v18089_v35 = vpack.c.bf16 %v3395_v8, %v3388_v5  ;;  %18949 = vst [vmem:[#allocation11_spill] sm:$0xff] %v18161_v40  ;;  %v18177_v22 = vsub.f32 %v3297_v39, %v18161_v40 }
 0x1c2   : > { %16551 = vmatpush3.bf16.msra.mxu1 %v17879_v41  ;;  %v3397_v23 = vsub.f32 %v3395_v8, %v3396_v19  ;;  %15448 = vmatprep.mubr.f32.mxu1 %v18081_v11 }
 0x1c3   : > { %16553 = vmatprep.subr.bf16.mxu1 %v17888_v55  ;;  %v3390_v30 = vsub.f32 %v3388_v5, %v3389_v21  ;;  %v18094_v27 = vpack.c.bf16 %v3396_v19, %v3389_v21  ;;  %v10497_v21 = vsub.f32 %v18147_v63, %v10496_v6  ;;  %18951 = vst [vmem:[#allocation13_spill] sm:$0xff] %v18177_v22 }
 0x1c4   : > { %v3398_v28 = vand.u32 4294901760, %v3397_v23  ;;  %15988 = vmatmul.mubr.f32.vlgmr.msra.gmra.mrb[16].mxu0 %v17909_v1 }
 0x1c5   : > { %v3391_v34 = vand.u32 4294901760, %v3390_v30  ;;  %16887 = vmatpush3.bf16.msra.mxu0 %v18066_v62  ;;  %16036 = vmatprep.mubr.f32.mxu0 %v17937_v26 }
 0x1c6   : > { %16889 = vmatprep.subr.bf16.mxu0 %v16888_v24 }
 0x1c7   : > { %v18101_v37 = vpack.c.bf16 %v3398_v28, %v3391_v34 }
 0x1c8   : > { %16037 = vmatmul.mubr.f32.vlgmr.msra.gmra.mrb[18].mxu0 %v17944_v31 }
 0x1c9   : > { %15449 = vmatmul.mubr.f32.vlgmr.msra.gmra.mrb[0].mxu1 %v18097_v33  ;;  %16891 = vmatpush3.bf16.msra.mxu0 %v16888_v24 }
 0x1ca   : > { %16555 = vmatpush3.bf16.msra.mxu1 %v17888_v55  ;;  %15455 = vmatprep.mubr.f32.mxu1 %v18030_v32  ;;  %v14568_v55 = vld [vmem:[%s18917_s2 + $0x30] sm:$0xff] }
 0x1cb   : > { %16557 = vmatprep.subr.bf16.mxu1 %v17881_v45  ;;  %16043 = vmatprep.mubr.f32.mxu0 %v17905_v61  ;;  %v3294_v49 = vsel %vm226_vm1, %v14568_v55, 0 }
 0x1cc   : > { %16893 = vmatprep.subr.bf16.mxu0 %v16892_v42  ;;  %v18139_v47 = vand.u32 4294901760, %v3294_v49 }
 0x1ce   : > { %18947 = vst [vmem:[#allocation9_spill] sm:$0xff] %v18139_v47  ;;  %v18153_v0 = vsub.f32 %v3294_v49, %v18139_v47 }
 0x1d0   : > { %16044 = vmatmul.mubr.f32.vlgmr.msra.gmra.mrb[18].mxu0 %v17909_v1  ;;  %18948 = vst [vmem:[#allocation10_spill] sm:$0xff] %v18153_v0 }
 0x1d1   : > { %15456 = vmatmul.mubr.f32.vlgmr.msra.gmra.mrb[0].mxu1 %v18052_v46  ;;  %16895 = vmatpush3.bf16.msra.mxu0 %v16892_v42 }
 0x1d2   : > { %16559 = vmatpush3.bf16.msra.mxu1 %v17881_v45  ;;  %15462 = vmatprep.mubr.f32.mxu1 %v18039_v48  ;;  %v14588_v45 = vld [vmem:[%s18916_s1 + $0xa0] sm:$0xff] }
 0x1d3   : > { %16561 = vmatprep.subr.bf16.mxu1 %v17879_v41  ;;  %16050 = vmatprep.mubr.f32.mxu0 %v17913_v36  ;;  %v10400_v50 = vand.u32 4294901760, %v14588_v45 }
 0x1d4   : > { %16897 = vmatprep.subr.bf16.mxu0 %v18066_v62 }
 0x1d5   : > { %v18145_v59 = vsub.f32 %v14588_v45, %v10400_v50  ;;  %v18167_v5 = vpack.c.bf16 %v10403_v53, %v10400_v50 }
 0x1d7   : > { %v10489_v2 = vand.u32 4294901760, %v18145_v59 }
 0x1d8   : > { %16051 = vmatmul.mubr.f32.vlgmr.msra.gmra.mrb[18].mxu0 %v17917_v3 }
 0x1d9   : > { %15463 = vmatmul.mubr.f32.vlgmr.msra.gmra.mrb[0].mxu1 %v18062_v60  ;;  %16899 = vmatpush3.bf16.msra.mxu0 %v18066_v62  ;;  %v10490_v19 = vsub.f32 %v18145_v59, %v10489_v2 }
 0x1da   : > { %16563 = vmatpush3.bf16.msra.mxu1 %v17879_v41  ;;  %15469 = vmatprep.mubr.f32.mxu1 %v18050_v54 }
 0x1db   : > { %16565 = vmatprep.subr.bf16.mxu1 %v17883_v51  ;;  %16057 = vmatprep.mubr.f32.mxu0 %v17920_v4  ;;  %v10491_v55 = vand.u32 4294901760, %v10490_v19 }
 0x1dc   : > { %16901 = vmatprep.subr.bf16.mxu0 %v16900_v43 }
 0x1e0   : > { %16058 = vmatmul.mubr.f32.vlgmr.msra.gmra.mrb[18].mxu0 %v17926_v13 }
 0x1e1   : > { %15470 = vmatmul.mubr.f32.vlgmr.msra.gmra.mrb[0].mxu1 %v18077_v7  ;;  %16903 = vmatpush3.bf16.msra.mxu0 %v16900_v43 }
 0x1e2   : > { %16567 = vmatpush3.bf16.msra.mxu1 %v17883_v51  ;;  %15476 = vmatprep.mubr.f32.mxu1 %v18030_v32  ;;  %v18164_v51 = vand.u32 4294901760, %v18153_v0 }
 0x1e3   : > { %16569 = vmatprep.subr.bf16.mxu1 %v17879_v41  ;;  %16064 = vmatprep.mubr.f32.mxu0 %v17905_v61 }
 0x1e4   : > { %16905 = vmatprep.subr.bf16.mxu0 %v18066_v62  ;;  %18950 = vst [vmem:[#allocation12_spill] sm:$0xff] %v18164_v51  ;;  %v3369_v24 = vsub.f32 %v18153_v0, %v18164_v51 }
 0x1e6   : > { %v18194_v44 = vand.u32 4294901760, %v3369_v24  ;;  %v14591_v24 = vld [vmem:[%s18916_s1 + $0xb8] sm:$0xff] }
 0x1e7   : > { %v15653_v8 = vpop.f32.mrb[8].mxu0 }
 0x1e8   : > { %v4827_v14 = vand.u32 4294901760, %v15653_v8  ;;  %v4804_v17 = vpop.f32.mrb[9].mxu0  ;;  %16065 = vmatmul.mubr.f32.vlgmr.msra.gmra.mrb[18].mxu0 %v17909_v1  ;;  %18953 = vst [vmem:[#allocation15_spill] sm:$0xff] %v18194_v44 }
 0x1e9   : > { %15477 = vmatmul.mubr.f32.vlgmr.msra.gmra.mrb[0].mxu1 %v18052_v46  ;;  %v4824_v23 = vand.u32 4294901760, %v4804_v17  ;;  %16907 = vmatpush3.bf16.msra.mxu0 %v18066_v62  ;;  %v10498_v62 = vand.u32 4294901760, %v10497_v21 }
 0x1ea   : > { %16571 = vmatpush3.bf16.msra.mxu1 %v17879_v41  ;;  %15483 = vmatprep.mubr.f32.mxu1 %v18030_v32  ;;  %v4919_v30 = vsub.f32 %v15653_v8, %v4827_v14  ;;  %v18190_v41 = vand.u32 4294901760, %v18177_v22 }
 0x1eb   : > { %16597 = vmatprep.subr.bf16.mxu1 %v18084_v18  ;;  %v18185_v28 = vpack.c.bf16 %v4827_v14, %v4824_v23  ;;  %v4912_v34 = vsub.f32 %v4804_v17, %v4824_v23  ;;  %16071 = vmatprep.mubr.f32.mxu0 %v17905_v61  ;;  %v16936_v58 = vpack.c.bf16 %v10498_v62, %v10491_v55  ;;  %v14590_v23 = vld [vmem:[%s18916_s1 + $0xb0] sm:$0xff]  ;;  %v14561_v62 = vld [vmem:[%s18917_s2 + $0x18] sm:$0xff] }
 0x1ec   : > { %v4920_v42 = vand.u32 4294901760, %v4919_v30  ;;  %16933 = vmatprep.subr.bf16.mxu0 %v18167_v5  ;;  %18952 = vst [vmem:[#allocation14_spill] sm:$0xff] %v18190_v41  ;;  %v3379_v8 = vsub.f32 %v18177_v22, %v18190_v41  ;;  %v16940_v17 = vpack.c.bf16 %v18147_v63, %v18145_v59  ;;  %v11412_v59 = vand.u32 4294901760, %v14591_v24  ;;  %v14560_v63 = vld [vmem:[%s18917_s2 + $0x10] sm:$0xff] }
 0x1ed   : > { %v4913_v43 = vand.u32 4294901760, %v4912_v34  ;;  %v18192_v45 = vpack.c.bf16 %v4919_v30, %v4912_v34 }
 0x1ee   : > { %v4921_v49 = vsub.f32 %v4919_v30, %v4920_v42  ;;  %v18212_v21 = vand.u32 4294901760, %v3379_v8  ;;  %v18248_v30 = vsub.f32 %v14591_v24, %v11412_v59 }
 0x1ef   : > { %v4914_v50 = vsub.f32 %v4912_v34, %v4913_v43  ;;  %v18196_v53 = vpack.c.bf16 %v4920_v42, %v4913_v43 }
 0x1f0   : > { %16072 = vmatmul.mubr.f32.vlgmr.msra.gmra.mrb[18].mxu0 %v17909_v1  ;;  %v4922_v39 = vand.u32 4294901760, %v4921_v49  ;;  %18954 = vst [vmem:[#allocation16_spill] sm:$0xff] %v18212_v21  ;;  %v18919_v55 = vand.u32 4294901760, %v18248_v30  ;;  %v3805_v49 = vsel %vm226_vm1, %v14561_v62, 0 }
 0x1f1   : > { %15484 = vmatmul.mubr.f32.vlgmr.msra.gmra.mrb[0].mxu1 %v18052_v46  ;;  %16935 = vmatpush3.bf16.msra.mxu0 %v18167_v5  ;;  %v4915_v14 = vand.u32 4294901760, %v4914_v50 }
 0x1f2   : > { %16599 = vmatpush3.bf16.msra.mxu1 %v18084_v18  ;;  %15532 = vmatprep.mubr.f32.mxu1 %v18194_v44 }
 0x1f3   : > { %16601 = vmatprep.subr.bf16.mxu1 %v18101_v37  ;;  %16120 = vmatprep.mubr.f32.mxu0 %v17937_v26  ;;  %v18209_v19 = vpack.c.bf16 %v4922_v39, %v4915_v14  ;;  %v11506_v39 = vsub.f32 %v18248_v30, %v18919_v55 }
 0x1f4   : > { %16121 = vmatmul.mubr.f32.vlgmr.msra.gmra.mrb[20].mxu0 %v17944_v31  ;;  %16937 = vmatprep.subr.bf16.mxu0 %v16936_v58 }
 0x1f5   : > { %16939 = vmatpush3.bf16.msra.mxu0 %v16936_v58  ;;  %16127 = vmatprep.mubr.f32.mxu0 %v17905_v61 }
 0x1f6   : > { %16941 = vmatprep.subr.bf16.mxu0 %v16940_v17 }
 0x1f9   : > { %15533 = vmatmul.mubr.f32.vlgmr.msra.gmra.mrb[0].mxu1 %v18212_v21 }
 0x1fa   : > { %16603 = vmatpush3.bf16.msra.mxu1 %v18101_v37  ;;  %15539 = vmatprep.mubr.f32.mxu1 %v18139_v47  ;;  %v16948_v37 = vpack.c.bf16 %v10496_v6, %v10489_v2  ;;  %v3802_v2 = vsel %vm226_vm1, %v14560_v63, 0 }
 0x1fb   : > { %16605 = vmatprep.subr.bf16.mxu1 %v18089_v35  ;;  %v18252_v34 = vand.u32 4294901760, %v3802_v2 }
 0x1fc   : > { %16128 = vmatmul.mubr.f32.vlgmr.msra.gmra.mrb[20].mxu0 %v17909_v1 }
 0x1fd   : > { %16943 = vmatpush3.bf16.msra.mxu0 %v16940_v17  ;;  %16134 = vmatprep.mubr.f32.mxu0 %v17913_v36  ;;  %v18263_v43 = vsub.f32 %v3802_v2, %v18252_v34 }
 0x1fe   : > { %16945 = vmatprep.subr.bf16.mxu0 %v18167_v5 }
 0x201   : > { %15540 = vmatmul.mubr.f32.vlgmr.msra.gmra.mrb[0].mxu1 %v18161_v40 }
 0x202   : > { %16607 = vmatpush3.bf16.msra.mxu1 %v18089_v35  ;;  %15546 = vmatprep.mubr.f32.mxu1 %v18153_v0  ;;  %v11409_v35 = vand.u32 4294901760, %v14590_v23 }
 0x203   : > { %16609 = vmatprep.subr.bf16.mxu1 %v18084_v18 }
 0x204   : > { %16135 = vmatmul.mubr.f32.vlgmr.msra.gmra.mrb[20].mxu0 %v17917_v3  ;;  %v18246_v6 = vsub.f32 %v14590_v23, %v11409_v35  ;;  %v18268_v50 = vpack.c.bf16 %v11412_v59, %v11409_v35  ;;  %v18283_v23 = vand.u32 4294901760, %v18263_v43  ;;  %v11507_v59 = vand.u32 4294901760, %v11506_v39 }
 0x205   : > { %16947 = vmatpush3.bf16.msra.mxu0 %v18167_v5  ;;  %16141 = vmatprep.mubr.f32.mxu0 %v17920_v4 }
 0x206   : > { %16949 = vmatprep.subr.bf16.mxu0 %v16948_v37  ;;  %v18920_v42 = vand.u32 4294901760, %v18246_v6 }
 0x208   : > { %v11499_v58 = vsub.f32 %v18246_v6, %v18920_v42 }
 0x209   : > { %15547 = vmatmul.mubr.f32.vlgmr.msra.gmra.mrb[0].mxu1 %v18177_v22 }
 0x20a   : > { %16611 = vmatpush3.bf16.msra.mxu1 %v18084_v18  ;;  %15553 = vmatprep.mubr.f32.mxu1 %v18164_v51  ;;  %v11500_v35 = vand.u32 4294901760, %v11499_v58  ;;  %v3877_v58 = vsub.f32 %v18263_v43, %v18283_v23 }
 0x20b   : > { %16613 = vmatprep.subr.bf16.mxu1 %v18094_v27 }
 0x20c   : > { %16142 = vmatmul.mubr.f32.vlgmr.msra.gmra.mrb[20].mxu0 %v17926_v13 }
 0x20d   : > { %16951 = vmatpush3.bf16.msra.mxu0 %v16948_v37  ;;  %16148 = vmatprep.mubr.f32.mxu0 %v17905_v61 }
 0x20e   : > { %16953 = vmatprep.subr.bf16.mxu0 %v18167_v5 }
 0x211   : > { %15554 = vmatmul.mubr.f32.vlgmr.msra.gmra.mrb[0].mxu1 %v18190_v41  ;;  %v18307_v41 = vand.u32 4294901760, %v3877_v58 }
 0x212   : > { %16615 = vmatpush3.bf16.msra.mxu1 %v18094_v27  ;;  %15560 = vmatprep.mubr.f32.mxu1 %v18139_v47  ;;  %v18278_v27 = vand.u32 4294901760, %v3805_v49 }
 0x213   : > { %16617 = vmatprep.subr.bf16.mxu1 %v18084_v18  ;;  %v15737_v8 = vpop.f32.mrb[10].mxu0 }
 0x214   : > { %v5845_v14 = vand.u32 4294901760, %v15737_v8  ;;  %v5822_v17 = vpop.f32.mrb[11].mxu0  ;;  %16149 = vmatmul.mubr.f32.vlgmr.msra.gmra.mrb[20].mxu0 %v17909_v1  ;;  %v18290_v55 = vsub.f32 %v3805_v49, %v18278_v27 }
 0x215   : > { %v5842_v37 = vand.u32 4294901760, %v5822_v17  ;;  %16955 = vmatpush3.bf16.msra.mxu0 %v18167_v5  ;;  %16155 = vmatprep.mubr.f32.mxu0 %v17905_v61 }
 0x216   : > { %v5937_v24 = vsub.f32 %v15737_v8, %v5845_v14  ;;  %16981 = vmatprep.subr.bf16.mxu0 %v18268_v50  ;;  %v16984_v8 = vpack.c.bf16 %v11507_v59, %v11500_v35  ;;  %v16988_v35 = vpack.c.bf16 %v18248_v30, %v18246_v6 }
 0x217   : > { %v18286_v63 = vpack.c.bf16 %v5845_v14, %v5842_v37  ;;  %v5930_v2 = vsub.f32 %v5822_v17, %v5842_v37  ;;  %v18303_v37 = vand.u32 4294901760, %v18290_v55 }
 0x218   : > { %v5938_v62 = vand.u32 4294901760, %v5937_v24 }
 0x219   : > { %15561 = vmatmul.mubr.f32.vlgmr.msra.gmra.mrb[0].mxu1 %v18161_v40  ;;  %v5931_v5 = vand.u32 4294901760, %v5930_v2  ;;  %v18292_v42 = vpack.c.bf16 %v5937_v24, %v5930_v2  ;;  %v3887_v59 = vsub.f32 %v18290_v55, %v18303_v37 }
 0x21a   : > { %16619 = vmatpush3.bf16.msra.mxu1 %v18084_v18  ;;  %15567 = vmatprep.mubr.f32.mxu1 %v18139_v47  ;;  %v5939_v39 = vsub.f32 %v5937_v24, %v5938_v62 }
 0x21b   : > { %16621 = vmatprep.subr.bf16.mxu1 %v17933_v20  ;;  %v5932_v14 = vsub.f32 %v5930_v2, %v5931_v5  ;;  %v18299_v17 = vpack.c.bf16 %v5938_v62, %v5931_v5  ;;  %v18321_v2 = vand.u32 4294901760, %v3887_v59  ;;  %v18955_v62 = vand.u32 4294901760, %v18246_v6 }
 0x21c   : > { %16156 = vmatmul.mubr.f32.vlgmr.msra.gmra.mrb[20].mxu0 %v17909_v1  ;;  %v5940_v49 = vand.u32 4294901760, %v5939_v39  ;;  %v18956_v5 = vand.u32 4294901760, %v18248_v30  ;;  %v14593_v39 = vld [vmem:[%s18916_s1 + $0xc8] sm:$0xff] }
 0x21d   : > { %16983 = vmatpush3.bf16.msra.mxu0 %v18268_v50  ;;  %16204 = vmatprep.mubr.f32.mxu0 %v17937_v26  ;;  %v5933_v18 = vand.u32 4294901760, %v5932_v14  ;;  %v12421_v30 = vand.u32 4294901760, %v14593_v39 }
 0x21e   : > { %16985 = vmatprep.subr.bf16.mxu0 %v16984_v8  ;;  %v16996_v58 = vpack.c.bf16 %v18956_v5, %v18955_v62  ;;  %v14573_v62 = vld [vmem:[%s18917_s2 + $0x48] sm:$0xff] }
 0x21f   : > { %v18309_v24 = vpack.c.bf16 %v5940_v49, %v5933_v18  ;;  %v18353_v49 = vsub.f32 %v14593_v39, %v12421_v30 }
 0x220   : > { %16205 = vmatmul.mubr.f32.vlgmr.msra.gmra.mrb[22].mxu0 %v17944_v31 }
 0x221   : > { %15568 = vmatmul.mubr.f32.vlgmr.msra.gmra.mrb[0].mxu1 %v18161_v40  ;;  %16987 = vmatpush3.bf16.msra.mxu0 %v16984_v8  ;;  %v14572_v8 = vld [vmem:[%s18917_s2 + $0x40] sm:$0xff] }
 0x222   : > { %16623 = vmatpush3.bf16.msra.mxu1 %v17933_v20  ;;  %15574 = vmatprep.mubr.f32.mxu1 %v18307_v41 }
 0x223   : > { %16625 = vmatprep.subr.bf16.mxu1 %v17948_v38  ;;  %16211 = vmatprep.mubr.f32.mxu0 %v17905_v61 }
 0x224   : > { %16989 = vmatprep.subr.bf16.mxu0 %v16988_v35 }
 0x228   : > { %16212 = vmatmul.mubr.f32.vlgmr.msra.gmra.mrb[22].mxu0 %v17909_v1 }
 0x229   : > { %15575 = vmatmul.mubr.f32.vlgmr.msra.gmra.mrb[0].mxu1 %v18321_v2  ;;  %16991 = vmatpush3.bf16.msra.mxu0 %v16988_v35  ;;  %v18926_v35 = vand.u32 4294901760, %v18353_v49 }
 0x22a   : > { %16627 = vmatpush3.bf16.msra.mxu1 %v17948_v38  ;;  %15581 = vmatprep.mubr.f32.mxu1 %v18252_v34  ;;  %v14592_v38 = vld [vmem:[%s18916_s1 + $0xc0] sm:$0xff] }
 0x22b   : > { %16629 = vmatprep.subr.bf16.mxu1 %v17939_v25  ;;  %16218 = vmatprep.mubr.f32.mxu0 %v17913_v36  ;;  %v12418_v6 = vand.u32 4294901760, %v14592_v38  ;;  %v12515_v51 = vsub.f32 %v18353_v49, %v18926_v35 }
 0x22c   : > { %16993 = vmatprep.subr.bf16.mxu0 %v18268_v50 }
 0x22d   : > { %v18351_v14 = vsub.f32 %v14592_v38, %v12418_v6  ;;  %v18370_v39 = vpack.c.bf16 %v12421_v30, %v12418_v6  ;;  %v4821_v30 = vsel %vm226_vm1, %v14573_v62, 0 }
 0x22e   : > { %v18391_v47 = vand.u32 4294901760, %v4821_v30 }
 0x22f   : > { %v18925_v18 = vand.u32 4294901760, %v18351_v14 }
 0x230   : > { %16219 = vmatmul.mubr.f32.vlgmr.msra.gmra.mrb[22].mxu0 %v17917_v3 }
 0x231   : > { %15582 = vmatmul.mubr.f32.vlgmr.msra.gmra.mrb[0].mxu1 %v18278_v27  ;;  %16995 = vmatpush3.bf16.msra.mxu0 %v18268_v50 }
 0x232   : > { %16631 = vmatpush3.bf16.msra.mxu1 %v17939_v25  ;;  %15588 = vmatprep.mubr.f32.mxu1 %v18263_v43  ;;  %v4818_v25 = vsel %vm226_vm1, %v14572_v8, 0  ;;  %v12508_v8 = vsub.f32 %v18351_v14, %v18925_v18 }
 0x233   : > { %16633 = vmatprep.subr.bf16.mxu1 %v17933_v20  ;;  %16225 = vmatprep.mubr.f32.mxu0 %v17920_v4  ;;  %v18364_v59 = vand.u32 4294901760, %v4818_v25 }
 0x234   : > { %16997 = vmatprep.subr.bf16.mxu0 %v16996_v58 }
 0x235   : > { %v18383_v6 = vsub.f32 %v4818_v25, %v18364_v59 }
 0x237   : > { %18957 = vst [vmem:[#allocation17_spill] sm:$0xff] %v18383_v6  ;;  %v18396_v62 = vand.u32 4294901760, %v18383_v6 }
 0x238   : > { %16226 = vmatmul.mubr.f32.vlgmr.msra.gmra.mrb[22].mxu0 %v17926_v13 }
 0x239   : > { %15589 = vmatmul.mubr.f32.vlgmr.msra.gmra.mrb[0].mxu1 %v18290_v55  ;;  %16999 = vmatpush3.bf16.msra.mxu0 %v16996_v58  ;;  %18958 = vst [vmem:[#allocation18_spill] sm:$0xff] %v18396_v62 }
 0x23a   : > { %16635 = vmatpush3.bf16.msra.mxu1 %v17933_v20  ;;  %15595 = vmatprep.mubr.f32.mxu1 %v18283_v23 }
 0x23b   : > { %16637 = vmatprep.subr.bf16.mxu1 %v17941_v29  ;;  %16232 = vmatprep.mubr.f32.mxu0 %v17905_v61 }
 0x23c   : > { %17001 = vmatprep.subr.bf16.mxu0 %v18268_v50 }
 0x23f   : > { %v15821_v5 = vpop.f32.mrb[12].mxu0 }
 0x240   : > { %v6863_v58 = vand.u32 4294901760, %v15821_v5  ;;  %v6840_v38 = vpop.f32.mrb[13].mxu0  ;;  %16233 = vmatmul.mubr.f32.vlgmr.msra.gmra.mrb[22].mxu0 %v17909_v1 }
 0x241   : > { %15596 = vmatmul.mubr.f32.vlgmr.msra.gmra.mrb[0].mxu1 %v18303_v37  ;;  %v6860_v22 = vand.u32 4294901760, %v6840_v38  ;;  %17003 = vmatpush3.bf16.msra.mxu0 %v18268_v50  ;;  %v12509_v50 = vand.u32 4294901760, %v12508_v8 }
 0x242   : > { %16639 = vmatpush3.bf16.msra.mxu1 %v17941_v29  ;;  %15602 = vmatprep.mubr.f32.mxu1 %v18252_v34  ;;  %v6955_v0 = vsub.f32 %v15821_v5, %v6863_v58  ;;  %v12516_v29 = vand.u32 4294901760, %v12515_v51  ;;  %v18403_v51 = vsub.f32 %v4821_v30, %v18391_v47 }
 0x243   : > { %16641 = vmatprep.subr.bf16.mxu1 %v17933_v20  ;;  %v18387_v18 = vpack.c.bf16 %v6863_v58, %v6860_v22  ;;  %v6948_v35 = vsub.f32 %v6840_v38, %v6860_v22  ;;  %16239 = vmatprep.mubr.f32.mxu0 %v17905_v61 }
 0x244   : > { %v6956_v40 = vand.u32 4294901760, %v6955_v0  ;;  %17029 = vmatprep.subr.bf16.mxu0 %v18370_v39  ;;  %v17032_v22 = vpack.c.bf16 %v12516_v29, %v12509_v50  ;;  %18959 = vst [vmem:[#allocation19_spill] sm:$0xff] %v18403_v51  ;;  %v18963_v50 = vand.u32 4294901760, %v18351_v14  ;;  %v18964_v29 = vand.u32 4294901760, %v18353_v49 }
 0x245   : > { %v6949_v21 = vand.u32 4294901760, %v6948_v35  ;;  %v18393_v25 = vpack.c.bf16 %v6955_v0, %v6948_v35 }
 0x246   : > { %v6957_v5 = vsub.f32 %v6955_v0, %v6956_v40  ;;  %v4893_v0 = vsub.f32 %v18383_v6, %v18396_v62 }
 0x247   : > { %v6950_v44 = vsub.f32 %v6948_v35, %v6949_v21  ;;  %v18398_v58 = vpack.c.bf16 %v6956_v40, %v6949_v21  ;;  %v17036_v40 = vpack.c.bf16 %v18353_v49, %v18351_v14 }
 0x248   : > { %16240 = vmatmul.mubr.f32.vlgmr.msra.gmra.mrb[22].mxu0 %v17909_v1  ;;  %v6958_v38 = vand.u32 4294901760, %v6957_v5  ;;  %v17044_v5 = vpack.c.bf16 %v18964_v29, %v18963_v50 }
 0x249   : > { %15603 = vmatmul.mubr.f32.vlgmr.msra.gmra.mrb[0].mxu1 %v18278_v27  ;;  %17031 = vmatpush3.bf16.msra.mxu0 %v18370_v39  ;;  %v6951_v8 = vand.u32 4294901760, %v6950_v44  ;;  %v18418_v44 = vand.u32 4294901760, %v18403_v51 }
 0x24a   : > { %16643 = vmatpush3.bf16.msra.mxu1 %v17933_v20  ;;  %15609 = vmatprep.mubr.f32.mxu1 %v18252_v34  ;;  %v18421_v20 = vand.u32 4294901760, %v4893_v0 }
 0x24b   : > { %16669 = vmatprep.subr.bf16.mxu1 %v18185_v28  ;;  %16288 = vmatprep.mubr.f32.mxu0 %v17937_v26  ;;  %v18414_v21 = vpack.c.bf16 %v6958_v38, %v6951_v8  ;;  %18960 = vst [vmem:[#allocation20_spill] sm:$0xff] %v18418_v44  ;;  %v4903_v35 = vsub.f32 %v18403_v51, %v18418_v44  ;;  %v14595_v38 = vld [vmem:[%s18916_s1 + $0xd8] sm:$0xff] }
 0x24c   : > { %16289 = vmatmul.mubr.f32.vlgmr.msra.gmra.mrb[24].mxu0 %v17944_v31  ;;  %17033 = vmatprep.subr.bf16.mxu0 %v17032_v22  ;;  %18961 = vst [vmem:[#allocation21_spill] sm:$0xff] %v18421_v20  ;;  %v13430_v14 = vand.u32 4294901760, %v14595_v38 }
 0x24d   : > { %17035 = vmatpush3.bf16.msra.mxu0 %v17032_v22  ;;  %16295 = vmatprep.mubr.f32.mxu0 %v17905_v61  ;;  %v18430_v30 = vand.u32 4294901760, %v4903_v35  ;;  %v14594_v22 = vld [vmem:[%s18916_s1 + $0xd0] sm:$0xff] }
 0x24e   : > { %17037 = vmatprep.subr.bf16.mxu0 %v17036_v40  ;;  %v18456_v8 = vsub.f32 %v14595_v38, %v13430_v14 }
 0x24f   : > { %18962 = vst [vmem:[#allocation22_spill] sm:$0xff] %v18430_v30 }
 0x251   : > { %15610 = vmatmul.mubr.f32.vlgmr.msra.gmra.mrb[0].mxu1 %v18278_v27 }
 0x252   : > { %16671 = vmatpush3.bf16.msra.mxu1 %v18185_v28  ;;  %15658 = vmatprep.mubr.f32.mxu1 %v18421_v20 }
 0x253   : > { %16673 = vmatprep.subr.bf16.mxu1 %v18209_v19 }
 0x254   : > { %16296 = vmatmul.mubr.f32.vlgmr.msra.gmra.mrb[24].mxu0 %v17909_v1 }
 0x255   : > { %17039 = vmatpush3.bf16.msra.mxu0 %v17036_v40  ;;  %16302 = vmatprep.mubr.f32.mxu0 %v17913_v36  ;;  %v18935_v40 = vand.u32 4294901760, %v18456_v8 }
 0x256   : > { %17041 = vmatprep.subr.bf16.mxu0 %v18370_v39 }
 0x257   : > { %v13524_v29 = vsub.f32 %v18456_v8, %v18935_v40 }
 0x259   : > { %15659 = vmatmul.mubr.f32.vlgmr.msra.gmra.mrb[0].mxu1 %v18430_v30 }
 0x25a   : > { %16675 = vmatpush3.bf16.msra.mxu1 %v18209_v19  ;;  %15665 = vmatprep.mubr.f32.mxu1 %v18364_v59  ;;  %v13427_v19 = vand.u32 4294901760, %v14594_v22 }
 0x25b   : > { %16677 = vmatprep.subr.bf16.mxu1 %v18192_v45 }
 0x25c   : > { %16303 = vmatmul.mubr.f32.vlgmr.msra.gmra.mrb[24].mxu0 %v17917_v3  ;;  %v18454_v49 = vsub.f32 %v14594_v22, %v13427_v19  ;;  %v18470_v35 = vpack.c.bf16 %v13430_v14, %v13427_v19 }
 0x25d   : > { %17043 = vmatpush3.bf16.msra.mxu0 %v18370_v39  ;;  %16309 = vmatprep.mubr.f32.mxu0 %v17920_v4 }
 0x25e   : > { %17045 = vmatprep.subr.bf16.mxu0 %v17044_v5  ;;  %v18936_v0 = vand.u32 4294901760, %v18454_v49 }
 0x260   : > { %v13517_v50 = vsub.f32 %v18454_v49, %v18936_v0  ;;  %v13525_v0 = vand.u32 4294901760, %v13524_v29 }
 0x261   : > { %15666 = vmatmul.mubr.f32.vlgmr.msra.gmra.mrb[0].mxu1 %v18391_v47 }
 0x262   : > { %16679 = vmatpush3.bf16.msra.mxu1 %v18192_v45  ;;  %15672 = vmatprep.mubr.f32.mxu1 %v18383_v6  ;;  %v14576_v45 = vld [vmem:[%s18917_s2 + $0x50] sm:$0xff]  ;;  %v13518_v40 = vand.u32 4294901760, %v13517_v50 }
 0x263   : > { %16681 = vmatprep.subr.bf16.mxu1 %v18185_v28 }
 0x264   : > { %16310 = vmatmul.mubr.f32.vlgmr.msra.gmra.mrb[24].mxu0 %v17926_v13  ;;  %v17080_v12 = vpack.c.bf16 %v13525_v0, %v13518_v40 }
 0x265   : > { %17047 = vmatpush3.bf16.msra.mxu0 %v17044_v5  ;;  %16316 = vmatprep.mubr.f32.mxu0 %v17905_v61  ;;  %v5836_v5 = vsel %vm226_vm1, %v14576_v45, 0  ;;  %v14577_v45 = vld [vmem:[%s18917_s2 + $0x58] sm:$0xff] }
 0x266   : > { %17049 = vmatprep.subr.bf16.mxu0 %v18370_v39  ;;  %v18483_v19 = vand.u32 4294901760, %v5836_v5  ;;  %v5839_v29 = vsel %vm226_vm1, %v14577_v45, 0  ;;  %v18966_v45 = vand.u32 4294901760, %v18456_v8 }
 0x268   : > { %v18497_v50 = vsub.f32 %v5836_v5, %v18483_v19 }
 0x269   : > { %15673 = vmatmul.mubr.f32.vlgmr.msra.gmra.mrb[0].mxu1 %v18403_v51 }
 0x26a   : > { %16683 = vmatpush3.bf16.msra.mxu1 %v18185_v28  ;;  %15679 = vmatprep.mubr.f32.mxu1 %v18396_v62  ;;  %v18509_v5 = vand.u32 4294901760, %v18497_v50 }
 0x26b   : > { %16685 = vmatprep.subr.bf16.mxu1 %v18196_v53  ;;  %v15905_v22 = vpop.f32.mrb[14].mxu0 }
 0x26c   : > { %v7878_v38 = vand.u32 4294901760, %v15905_v22  ;;  %v7864_v51 = vpop.f32.mrb[15].mxu0  ;;  %16317 = vmatmul.mubr.f32.vlgmr.msra.gmra.mrb[24].mxu0 %v17909_v1 }
 0x26d   : > { %v7875_v62 = vand.u32 4294901760, %v7864_v51  ;;  %17051 = vmatpush3.bf16.msra.mxu0 %v18370_v39  ;;  %16323 = vmatprep.mubr.f32.mxu0 %v17905_v61 }
 0x26e   : > { %v7970_v14 = vsub.f32 %v15905_v22, %v7878_v38  ;;  %17077 = vmatprep.subr.bf16.mxu0 %v18470_v35 }
 0x26f   : > { %v18489_v6 = vpack.c.bf16 %v7878_v38, %v7875_v62  ;;  %v7963_v30 = vsub.f32 %v7864_v51, %v7875_v62 }
 0x270   : > { %v7971_v20 = vand.u32 4294901760, %v7970_v14 }
 0x271   : > { %15680 = vmatmul.mubr.f32.vlgmr.msra.gmra.mrb[0].mxu1 %v18418_v44  ;;  %v7964_v39 = vand.u32 4294901760, %v7963_v30  ;;  %v18492_v57 = vpack.c.bf16 %v7970_v14, %v7963_v30  ;;  %v18504_v44 = vand.u32 4294901760, %v5839_v29 }
 0x272   : > { %16687 = vmatpush3.bf16.msra.mxu1 %v18196_v53  ;;  %15686 = vmatprep.mubr.f32.mxu1 %v18364_v59  ;;  %v7972_v22 = vsub.f32 %v7970_v14, %v7971_v20  ;;  %v18965_v14 = vand.u32 4294901760, %v18454_v49 }
 0x273   : > { %16689 = vmatprep.subr.bf16.mxu1 %v18185_v28  ;;  %v7965_v62 = vsub.f32 %v7963_v30, %v7964_v39  ;;  %v18501_v51 = vpack.c.bf16 %v7971_v20, %v7964_v39  ;;  %v17084_v20 = vpack.c.bf16 %v18456_v8, %v18454_v49  ;;  %v18518_v30 = vsub.f32 %v5839_v29, %v18504_v44 }
 0x274   : > { %16324 = vmatmul.mubr.f32.vlgmr.msra.gmra.mrb[24].mxu0 %v17909_v1  ;;  %v7973_v38 = vand.u32 4294901760, %v7972_v22  ;;  %v17092_v39 = vpack.c.bf16 %v18966_v45, %v18965_v14 }
 0x275   : > { %17079 = vmatpush3.bf16.msra.mxu0 %v18470_v35  ;;  %16372 = vmatprep.mubr.f32.mxu0 %v17937_v26  ;;  %v7966_v53 = vand.u32 4294901760, %v7965_v62  ;;  %v5911_v26 = vsub.f32 %v18497_v50, %v18509_v5 }
 0x276   : > { %17081 = vmatprep.subr.bf16.mxu0 %v17080_v12 }
 0x277   : > { %v18511_v0 = vpack.c.bf16 %v7973_v38, %v7966_v53  ;;  %v18529_v40 = vand.u32 4294901760, %v5911_v26 }
 0x278   : > { %16373 = vmatmul.mubr.f32.vlgmr.msra.gmra.mrb[26].mxu0 %v17944_v31  ;;  %v18527_v31 = vand.u32 4294901760, %v18518_v30 }
 0x279   : > { %15687 = vmatmul.mubr.f32.vlgmr.msra.gmra.mrb[0].mxu1 %v18391_v47  ;;  %17083 = vmatpush3.bf16.msra.mxu0 %v17080_v12 }
 0x27a   : > { %16691 = vmatpush3.bf16.msra.mxu1 %v18185_v28  ;;  %15693 = vmatprep.mubr.f32.mxu1 %v18364_v59  ;;  %v5921_v12 = vsub.f32 %v18518_v30, %v18527_v31 }
 0x27b   : > { %16717 = vmatprep.subr.bf16.mxu1 %v18286_v63  ;;  %16379 = vmatprep.mubr.f32.mxu0 %v17905_v61 }
 0x27c   : > { %17085 = vmatprep.subr.bf16.mxu0 %v17084_v20  ;;  %v18540_v28 = vand.u32 4294901760, %v5921_v12 }
 0x280   : > { %16380 = vmatmul.mubr.f32.vlgmr.msra.gmra.mrb[26].mxu0 %v17909_v1 }
 0x281   : > { %15694 = vmatmul.mubr.f32.vlgmr.msra.gmra.mrb[0].mxu1 %v18391_v47  ;;  %17087 = vmatpush3.bf16.msra.mxu0 %v17084_v20  ;;  %v14581_v20 = vld [vmem:[%s18917_s2 + $0x68] sm:$0xff] }
 0x282   : > { %16719 = vmatpush3.bf16.msra.mxu1 %v18286_v63  ;;  %15742 = vmatprep.mubr.f32.mxu1 %v18529_v40 }
 0x283   : > { %16721 = vmatprep.subr.bf16.mxu1 %v18309_v24  ;;  %16386 = vmatprep.mubr.f32.mxu0 %v17913_v36 }
 0x284   : > { %17089 = vmatprep.subr.bf16.mxu0 %v18470_v35 }
 0x288   : > { %16387 = vmatmul.mubr.f32.vlgmr.msra.gmra.mrb[26].mxu0 %v17917_v3  ;;  %v14580_v3 = vld [vmem:[%s18917_s2 + $0x60] sm:$0xff] }
 0x289   : > { %15743 = vmatmul.mubr.f32.vlgmr.msra.gmra.mrb[0].mxu1 %v18540_v28  ;;  %17091 = vmatpush3.bf16.msra.mxu0 %v18470_v35  ;;  %v6854_v49 = vsel %vm226_vm1, %v14580_v3, 0 }
 0x28a   : > { %16723 = vmatpush3.bf16.msra.mxu1 %v18309_v24  ;;  %15749 = vmatprep.mubr.f32.mxu1 %v18483_v19  ;;  %v18575_v53 = vand.u32 4294901760, %v6854_v49 }
 0x28b   : > { %16725 = vmatprep.subr.bf16.mxu1 %v18292_v42  ;;  %16393 = vmatprep.mubr.f32.mxu0 %v17920_v4 }
 0x28c   : > { %17093 = vmatprep.subr.bf16.mxu0 %v17092_v39  ;;  %v18587_v45 = vsub.f32 %v6854_v49, %v18575_v53 }
 0x290   : > { %16394 = vmatmul.mubr.f32.vlgmr.msra.gmra.mrb[26].mxu0 %v17926_v13 }
 0x291   : > { %15750 = vmatmul.mubr.f32.vlgmr.msra.gmra.mrb[0].mxu1 %v18504_v44  ;;  %17095 = vmatpush3.bf16.msra.mxu0 %v17092_v39  ;;  %v6857_v39 = vsel %vm226_vm1, %v14581_v20, 0 }
 0x292   : > { %16727 = vmatpush3.bf16.msra.mxu1 %v18292_v42  ;;  %15756 = vmatprep.mubr.f32.mxu1 %v18497_v50  ;;  %v18593_v3 = vand.u32 4294901760, %v6857_v39 }
 0x293   : > { %16729 = vmatprep.subr.bf16.mxu1 %v18286_v63  ;;  %16400 = vmatprep.mubr.f32.mxu0 %v17905_v61 }
 0x294   : > { %17097 = vmatprep.subr.bf16.mxu0 %v18470_v35 }
 0x297   : > { %v15989_v36 = vpop.f32.mrb[16].mxu0 }
 0x298   : > { %v8887_v4 = vand.u32 4294901760, %v15989_v36  ;;  %v8873_v13 = vpop.f32.mrb[17].mxu0  ;;  %16401 = vmatmul.mubr.f32.vlgmr.msra.gmra.mrb[26].mxu0 %v17909_v1 }
 0x299   : > { %15757 = vmatmul.mubr.f32.vlgmr.msra.gmra.mrb[0].mxu1 %v18518_v30  ;;  %v8884_v42 = vand.u32 4294901760, %v8873_v13  ;;  %17099 = vmatpush3.bf16.msra.mxu0 %v18470_v35 }
 0x29a   : > { %16731 = vmatpush3.bf16.msra.mxu1 %v18286_v63  ;;  %15763 = vmatprep.mubr.f32.mxu1 %v18509_v5  ;;  %v8979_v24 = vsub.f32 %v15989_v36, %v8887_v4 }
 0x29b   : > { %16733 = vmatprep.subr.bf16.mxu1 %v18299_v17  ;;  %v18570_v8 = vpack.c.bf16 %v8887_v4, %v8884_v42  ;;  %v8972_v29 = vsub.f32 %v8873_v13, %v8884_v42  ;;  %16407 = vmatprep.mubr.f32.mxu0 %v17905_v61 }
 0x29c   : > { %v8980_v22 = vand.u32 4294901760, %v8979_v24 }
 0x29d   : > { %v8973_v62 = vand.u32 4294901760, %v8972_v29  ;;  %v18573_v38 = vpack.c.bf16 %v8979_v24, %v8972_v29 }
 0x29e   : > { %v8981_v35 = vsub.f32 %v8979_v24, %v8980_v22 }
 0x29f   : > { %v8974_v26 = vsub.f32 %v8972_v29, %v8973_v62  ;;  %v18580_v12 = vpack.c.bf16 %v8980_v22, %v8973_v62 }
 0x2a0   : > { %16408 = vmatmul.mubr.f32.vlgmr.msra.gmra.mrb[26].mxu0 %v17909_v1  ;;  %v8982_v14 = vand.u32 4294901760, %v8981_v35  ;;  %v18596_v1 = vand.u32 4294901760, %v18587_v45 }
 0x2a1   : > { %15764 = vmatmul.mubr.f32.vlgmr.msra.gmra.mrb[0].mxu1 %v18527_v31  ;;  %v8975_v61 = vand.u32 4294901760, %v8974_v26 }
 0x2a2   : > { %16735 = vmatpush3.bf16.msra.mxu1 %v18299_v17  ;;  %15770 = vmatprep.mubr.f32.mxu1 %v18483_v19  ;;  %v18600_v17 = vsub.f32 %v6857_v39, %v18593_v3  ;;  %v6929_v4 = vsub.f32 %v18587_v45, %v18596_v1 }
 0x2a3   : > { %16737 = vmatprep.subr.bf16.mxu1 %v18286_v63  ;;  %v18591_v36 = vpack.c.bf16 %v8982_v14, %v8975_v61 }
 0x2a4   : > { %v18608_v13 = vand.u32 4294901760, %v18600_v17  ;;  %v18610_v42 = vand.u32 4294901760, %v6929_v4 }
 0x2a6   : > { %v6939_v24 = vsub.f32 %v18600_v17, %v18608_v13 }
 0x2a9   : > { %15771 = vmatmul.mubr.f32.vlgmr.msra.gmra.mrb[0].mxu1 %v18504_v44 }
 0x2aa   : > { %16739 = vmatpush3.bf16.msra.mxu1 %v18286_v63  ;;  %15777 = vmatprep.mubr.f32.mxu1 %v18483_v19  ;;  %v18618_v63 = vand.u32 4294901760, %v6939_v24 }
 0x2ab   : > { %16765 = vmatprep.subr.bf16.mxu1 %v18387_v18 }
 0x2b1   : > { %15778 = vmatmul.mubr.f32.vlgmr.msra.gmra.mrb[0].mxu1 %v18504_v44 }
 0x2b2   : > { %16767 = vmatpush3.bf16.msra.mxu1 %v18387_v18  ;;  %15826 = vmatprep.mubr.f32.mxu1 %v18610_v42 }
 0x2b3   : > { %16769 = vmatprep.subr.bf16.mxu1 %v18414_v21 }
 0x2b9   : > { %15827 = vmatmul.mubr.f32.vlgmr.msra.gmra.mrb[0].mxu1 %v18618_v63 }
 0x2ba   : > { %16771 = vmatpush3.bf16.msra.mxu1 %v18414_v21  ;;  %15833 = vmatprep.mubr.f32.mxu1 %v18575_v53 }
 0x2bb   : > { %16773 = vmatprep.subr.bf16.mxu1 %v18393_v25 }
 0x2c1   : > { %15834 = vmatmul.mubr.f32.vlgmr.msra.gmra.mrb[0].mxu1 %v18593_v3 }
 0x2c2   : > { %16775 = vmatpush3.bf16.msra.mxu1 %v18393_v25  ;;  %15840 = vmatprep.mubr.f32.mxu1 %v18587_v45 }
 0x2c3   : > { %16777 = vmatprep.subr.bf16.mxu1 %v18387_v18  ;;  %v16073_v49 = vpop.f32.mrb[18].mxu0 }
 0x2c4   : > { %v9896_v29 = vand.u32 4294901760, %v16073_v49  ;;  %v9882_v22 = vpop.f32.mrb[19].mxu0 }
 0x2c5   : > { %v9893_v62 = vand.u32 4294901760, %v9882_v22 }
 0x2c6   : > { %v9988_v35 = vsub.f32 %v16073_v49, %v9896_v29 }
 0x2c7   : > { %v18628_v20 = vpack.c.bf16 %v9896_v29, %v9893_v62  ;;  %v9981_v21 = vsub.f32 %v9882_v22, %v9893_v62 }
 0x2c8   : > { %v9989_v26 = vand.u32 4294901760, %v9988_v35 }
 0x2c9   : > { %15841 = vmatmul.mubr.f32.vlgmr.msra.gmra.mrb[0].mxu1 %v18600_v17  ;;  %v9982_v14 = vand.u32 4294901760, %v9981_v21  ;;  %v18631_v61 = vpack.c.bf16 %v9988_v35, %v9981_v21 }
 0x2ca   : > { %16779 = vmatpush3.bf16.msra.mxu1 %v18387_v18  ;;  %15847 = vmatprep.mubr.f32.mxu1 %v18596_v1  ;;  %v9990_v25 = vsub.f32 %v9988_v35, %v9989_v26 }
 0x2cb   : > { %16781 = vmatprep.subr.bf16.mxu1 %v18398_v58  ;;  %v9983_v39 = vsub.f32 %v9981_v21, %v9982_v14  ;;  %v18636_v4 = vpack.c.bf16 %v9989_v26, %v9982_v14 }
 0x2cc   : > { %v9991_v24 = vand.u32 4294901760, %v9990_v25 }
 0x2cd   : > { %v9984_v49 = vand.u32 4294901760, %v9983_v39 }
 0x2cf   : > { %v18638_v29 = vpack.c.bf16 %v9991_v24, %v9984_v49 }
 0x2d1   : > { %15848 = vmatmul.mubr.f32.vlgmr.msra.gmra.mrb[0].mxu1 %v18608_v13 }
 0x2d2   : > { %16783 = vmatpush3.bf16.msra.mxu1 %v18398_v58  ;;  %15854 = vmatprep.mubr.f32.mxu1 %v18575_v53 }
 0x2d3   : > { %16785 = vmatprep.subr.bf16.mxu1 %v18387_v18 }
 0x2d9   : > { %15855 = vmatmul.mubr.f32.vlgmr.msra.gmra.mrb[0].mxu1 %v18593_v3 }
 0x2da   : > { %16787 = vmatpush3.bf16.msra.mxu1 %v18387_v18  ;;  %15861 = vmatprep.mubr.f32.mxu1 %v18575_v53 }
 0x2db   : > { %16813 = vmatprep.subr.bf16.mxu1 %v18489_v6 }
 0x2e1   : > { %15862 = vmatmul.mubr.f32.vlgmr.msra.gmra.mrb[0].mxu1 %v18593_v3 }
 0x2e2   : > { %16815 = vmatpush3.bf16.msra.mxu1 %v18489_v6  ;;  %15910 = vmatprep.mubr.f32.mxu1 %v18081_v11 }
 0x2e3   : > { %16817 = vmatprep.subr.bf16.mxu1 %v18511_v0 }
 0x2e9   : > { %15911 = vmatmul.mubr.f32.vlgmr.msra.gmra.mrb[0].mxu1 %v18097_v33 }
 0x2ea   : > { %16819 = vmatpush3.bf16.msra.mxu1 %v18511_v0  ;;  %15917 = vmatprep.mubr.f32.mxu1 %v18030_v32 }
 0x2eb   : > { %16821 = vmatprep.subr.bf16.mxu1 %v18492_v57 }
 0x2ef   : > { %v16157_v18 = vpop.f32.mrb[20].mxu0 }
 0x2f0   : > { %v10905_v58 = vand.u32 4294901760, %v16157_v18  ;;  %v10891_v22 = vpop.f32.mrb[21].mxu0 }
 0x2f1   : > { %15918 = vmatmul.mubr.f32.vlgmr.msra.gmra.mrb[0].mxu1 %v18052_v46  ;;  %v10902_v62 = vand.u32 4294901760, %v10891_v22 }
 0x2f2   : > { %16823 = vmatpush3.bf16.msra.mxu1 %v18492_v57  ;;  %15924 = vmatprep.mubr.f32.mxu1 %v18039_v48  ;;  %v10997_v11 = vsub.f32 %v16157_v18, %v10905_v58 }
 0x2f3   : > { %16825 = vmatprep.subr.bf16.mxu1 %v18489_v6  ;;  %v18660_v33 = vpack.c.bf16 %v10905_v58, %v10902_v62  ;;  %v10990_v0 = vsub.f32 %v10891_v22, %v10902_v62 }
 0x2f4   : > { %v10998_v35 = vand.u32 4294901760, %v10997_v11 }
 0x2f5   : > { %v10991_v21 = vand.u32 4294901760, %v10990_v0  ;;  %v18662_v26 = vpack.c.bf16 %v10997_v11, %v10990_v0 }
 0x2f6   : > { %v10999_v14 = vsub.f32 %v10997_v11, %v10998_v35 }
 0x2f7   : > { %v10992_v25 = vsub.f32 %v10990_v0, %v10991_v21  ;;  %v18664_v39 = vpack.c.bf16 %v10998_v35, %v10991_v21 }
 0x2f8   : > { %v11000_v24 = vand.u32 4294901760, %v10999_v14 }
 0x2f9   : > { %15925 = vmatmul.mubr.f32.vlgmr.msra.gmra.mrb[0].mxu1 %v18062_v60  ;;  %v10993_v57 = vand.u32 4294901760, %v10992_v25  ;;  %v18967_v25 = vld [vmem:[#allocation7_spill] sm:$0xff] }
 0x2fa   : > { %16827 = vmatpush3.bf16.msra.mxu1 %v18489_v6  ;;  %15931 = vmatprep.mubr.f32.mxu1 %v18050_v54 }
 0x2fb   : > { %16829 = vmatprep.subr.bf16.mxu1 %v18501_v51  ;;  %v18670_v48 = vpack.c.bf16 %v11000_v24, %v10993_v57  ;;  %v18968_v24 = vld [vmem:[#allocation8_spill] sm:$0xff] }
 0x301   : > { %15932 = vmatmul.mubr.f32.vlgmr.msra.gmra.mrb[0].mxu1 %v18077_v7 }
 0x302   : > { %16831 = vmatpush3.bf16.msra.mxu1 %v18501_v51  ;;  %15938 = vmatprep.mubr.f32.mxu1 %v18030_v32 }
 0x303   : > { %16833 = vmatprep.subr.bf16.mxu1 %v18489_v6 }
 0x309   : > { %15939 = vmatmul.mubr.f32.vlgmr.msra.gmra.mrb[0].mxu1 %v18052_v46 }
 0x30a   : > { %16835 = vmatpush3.bf16.msra.mxu1 %v18489_v6  ;;  %15945 = vmatprep.mubr.f32.mxu1 %v18030_v32 }
 0x30b   : > { %16861 = vmatprep.subr.bf16.mxu1 %v18570_v8 }
 0x311   : > { %15946 = vmatmul.mubr.f32.vlgmr.msra.gmra.mrb[0].mxu1 %v18052_v46 }
 0x312   : > { %16863 = vmatpush3.bf16.msra.mxu1 %v18570_v8  ;;  %15994 = vmatprep.mubr.f32.mxu1 %v18307_v41 }
 0x313   : > { %16865 = vmatprep.subr.bf16.mxu1 %v18591_v36 }
 0x319   : > { %15995 = vmatmul.mubr.f32.vlgmr.msra.gmra.mrb[0].mxu1 %v18321_v2 }
 0x31a   : > { %16867 = vmatpush3.bf16.msra.mxu1 %v18591_v36  ;;  %16001 = vmatprep.mubr.f32.mxu1 %v18252_v34 }
 0x31b   : > { %16869 = vmatprep.subr.bf16.mxu1 %v18573_v38  ;;  %v16241_v54 = vpop.f32.mrb[22].mxu0 }
 0x31c   : > { %v11914_v32 = vand.u32 4294901760, %v16241_v54  ;;  %v11900_v60 = vpop.f32.mrb[23].mxu0 }
 0x31d   : > { %v11911_v7 = vand.u32 4294901760, %v11900_v60 }
 0x31e   : > { %v12006_v6 = vsub.f32 %v16241_v54, %v11914_v32 }
 0x31f   : > { %v18688_v46 = vpack.c.bf16 %v11914_v32, %v11911_v7  ;;  %v11999_v51 = vsub.f32 %v11900_v60, %v11911_v7 }
 0x320   : > { %v12007_v49 = vand.u32 4294901760, %v12006_v6 }
 0x321   : > { %16002 = vmatmul.mubr.f32.vlgmr.msra.gmra.mrb[0].mxu1 %v18278_v27  ;;  %v12000_v41 = vand.u32 4294901760, %v11999_v51  ;;  %v18691_v18 = vpack.c.bf16 %v12006_v6, %v11999_v51 }
 0x322   : > { %16871 = vmatpush3.bf16.msra.mxu1 %v18573_v38  ;;  %16008 = vmatprep.mubr.f32.mxu1 %v18263_v43  ;;  %v12008_v2 = vsub.f32 %v12006_v6, %v12007_v49 }
 0x323   : > { %16873 = vmatprep.subr.bf16.mxu1 %v18570_v8  ;;  %v12001_v36 = vsub.f32 %v11999_v51, %v12000_v41  ;;  %v18696_v58 = vpack.c.bf16 %v12007_v49, %v12000_v41 }
 0x324   : > { %v12009_v22 = vand.u32 4294901760, %v12008_v2 }
 0x325   : > { %v12002_v62 = vand.u32 4294901760, %v12001_v36 }
 0x327   : > { %v18698_v11 = vpack.c.bf16 %v12009_v22, %v12002_v62  ;;  %v18972_v62 = vld [vmem:[#allocation11_spill] sm:$0xff] }
 0x329   : > { %16009 = vmatmul.mubr.f32.vlgmr.msra.gmra.mrb[0].mxu1 %v18290_v55 }
 0x32a   : > { %16875 = vmatpush3.bf16.msra.mxu1 %v18570_v8  ;;  %16015 = vmatprep.mubr.f32.mxu1 %v18283_v23 }
 0x32b   : > { %16877 = vmatprep.subr.bf16.mxu1 %v18580_v12 }
 0x331   : > { %16016 = vmatmul.mubr.f32.vlgmr.msra.gmra.mrb[0].mxu1 %v18303_v37 }
 0x332   : > { %16879 = vmatpush3.bf16.msra.mxu1 %v18580_v12  ;;  %16022 = vmatprep.mubr.f32.mxu1 %v18252_v34 }
 0x333   : > { %16881 = vmatprep.subr.bf16.mxu1 %v18570_v8 }
 0x339   : > { %16023 = vmatmul.mubr.f32.vlgmr.msra.gmra.mrb[0].mxu1 %v18278_v27 }
 0x33a   : > { %16883 = vmatpush3.bf16.msra.mxu1 %v18570_v8  ;;  %16029 = vmatprep.mubr.f32.mxu1 %v18252_v34 }
 0x33b   : > { %16909 = vmatprep.subr.bf16.mxu1 %v18628_v20 }
 0x341   : > { %16030 = vmatmul.mubr.f32.vlgmr.msra.gmra.mrb[0].mxu1 %v18278_v27 }
 0x342   : > { %16911 = vmatpush3.bf16.msra.mxu1 %v18628_v20  ;;  %16078 = vmatprep.mubr.f32.mxu1 %v17857_v15 }
 0x343   : > { %16913 = vmatprep.subr.bf16.mxu1 %v18638_v29 }
 0x347   : > { %v16325_v55 = vpop.f32.mrb[24].mxu0 }
 0x348   : > { %v12923_v43 = vand.u32 4294901760, %v16325_v55  ;;  %v12909_v23 = vpop.f32.mrb[25].mxu0 }
 0x349   : > { %16079 = vmatmul.mubr.f32.vlgmr.msra.gmra.mrb[0].mxu1 %v17998_v16  ;;  %v12920_v37 = vand.u32 4294901760, %v12909_v23 }
 0x34a   : > { %16915 = vmatpush3.bf16.msra.mxu1 %v18638_v29  ;;  %16085 = vmatprep.mubr.f32.mxu1 %v17845_v9  ;;  %v13015_v34 = vsub.f32 %v16325_v55, %v12923_v43  ;;  %v18973_v55 = vld [vmem:[#allocation10_spill] sm:$0xff] }
 0x34b   : > { %16917 = vmatprep.subr.bf16.mxu1 %v18631_v61  ;;  %v18720_v27 = vpack.c.bf16 %v12923_v43, %v12920_v37  ;;  %v13008_v8 = vsub.f32 %v12909_v23, %v12920_v37  ;;  %v18975_v43 = vld [vmem:[#allocation12_spill] sm:$0xff]  ;;  %v18976_v23 = vld [vmem:[#allocation14_spill] sm:$0xff]  ;;  %v18980_v37 = vld [vmem:[#allocation19_spill] sm:$0xff] }
 0x34c   : > { %v13016_v38 = vand.u32 4294901760, %v13015_v34 }
 0x34d   : > { %v13009_v15 = vand.u32 4294901760, %v13008_v8  ;;  %v18722_v12 = vpack.c.bf16 %v13015_v34, %v13008_v8 }
 0x34e   : > { %v13017_v0 = vsub.f32 %v13015_v34, %v13016_v38  ;;  %v18981_v34 = vld [vmem:[#allocation18_spill] sm:$0xff] }
 0x34f   : > { %v13010_v35 = vsub.f32 %v13008_v8, %v13009_v15  ;;  %v18724_v21 = vpack.c.bf16 %v13016_v38, %v13009_v15 }
 0x350   : > { %v13018_v16 = vand.u32 4294901760, %v13017_v0 }
 0x351   : > { %16086 = vmatmul.mubr.f32.vlgmr.msra.gmra.mrb[0].mxu1 %v17968_v52  ;;  %v13011_v29 = vand.u32 4294901760, %v13010_v35 }
 0x352   : > { %16919 = vmatpush3.bf16.msra.mxu1 %v18631_v61  ;;  %16092 = vmatprep.mubr.f32.mxu1 %v17848_v10  ;;  %v18969_v10 = vld [vmem:[#allocation15_spill] sm:$0xff] }
 0x353   : > { %16921 = vmatprep.subr.bf16.mxu1 %v18628_v20  ;;  %v18730_v14 = vpack.c.bf16 %v13018_v16, %v13011_v29 }
 0x359   : > { %16093 = vmatmul.mubr.f32.vlgmr.msra.gmra.mrb[0].mxu1 %v17976_v56 }
 0x35a   : > { %16923 = vmatpush3.bf16.msra.mxu1 %v18628_v20  ;;  %16099 = vmatprep.mubr.f32.mxu1 %v18967_v25 }
 0x35b   : > { %16925 = vmatprep.subr.bf16.mxu1 %v18636_v4 }
 0x361   : > { %16100 = vmatmul.mubr.f32.vlgmr.msra.gmra.mrb[0].mxu1 %v18968_v24 }
 0x362   : > { %16927 = vmatpush3.bf16.msra.mxu1 %v18636_v4  ;;  %16106 = vmatprep.mubr.f32.mxu1 %v17845_v9 }
 0x363   : > { %16929 = vmatprep.subr.bf16.mxu1 %v18628_v20 }
 0x369   : > { %16107 = vmatmul.mubr.f32.vlgmr.msra.gmra.mrb[0].mxu1 %v17968_v52 }
 0x36a   : > { %16931 = vmatpush3.bf16.msra.mxu1 %v18628_v20  ;;  %16113 = vmatprep.mubr.f32.mxu1 %v17845_v9  ;;  %v18970_v9 = vld [vmem:[#allocation16_spill] sm:$0xff] }
 0x36b   : > { %16957 = vmatprep.subr.bf16.mxu1 %v18660_v33 }
 0x371   : > { %16114 = vmatmul.mubr.f32.vlgmr.msra.gmra.mrb[0].mxu1 %v17968_v52  ;;  %v18971_v52 = vld [vmem:[#allocation9_spill] sm:$0xff] }
 0x372   : > { %16959 = vmatpush3.bf16.msra.mxu1 %v18660_v33  ;;  %16162 = vmatprep.mubr.f32.mxu1 %v18969_v10 }
 0x373   : > { %16961 = vmatprep.subr.bf16.mxu1 %v18670_v48  ;;  %v16409_v56 = vpop.f32.mrb[26].mxu0 }
 0x374   : > { %v13932_v61 = vand.u32 4294901760, %v16409_v56  ;;  %v13918_v4 = vpop.f32.mrb[27].mxu0 }
 0x375   : > { %v13929_v57 = vand.u32 4294901760, %v13918_v4 }
 0x376   : > { %v14024_v54 = vsub.f32 %v16409_v56, %v13932_v61 }
 0x377   : > { %v18748_v32 = vpack.c.bf16 %v13932_v61, %v13929_v57  ;;  %v14017_v20 = vsub.f32 %v13918_v4, %v13929_v57 }
 0x378   : > { %v14025_v60 = vand.u32 4294901760, %v14024_v54 }
 0x379   : > { %16163 = vmatmul.mubr.f32.vlgmr.msra.gmra.mrb[0].mxu1 %v18970_v9  ;;  %v14018_v7 = vand.u32 4294901760, %v14017_v20  ;;  %v18751_v6 = vpack.c.bf16 %v14024_v54, %v14017_v20 }
 0x37a   : > { %16963 = vmatpush3.bf16.msra.mxu1 %v18670_v48  ;;  %16169 = vmatprep.mubr.f32.mxu1 %v18971_v52  ;;  %v14026_v51 = vsub.f32 %v14024_v54, %v14025_v60  ;;  %v18974_v48 = vld [vmem:[#allocation13_spill] sm:$0xff] }
 0x37b   : > { %16965 = vmatprep.subr.bf16.mxu1 %v18662_v26  ;;  %v14019_v49 = vsub.f32 %v14017_v20, %v14018_v7  ;;  %v18756_v41 = vpack.c.bf16 %v14025_v60, %v14018_v7 }
 0x37c   : > { %v14027_v2 = vand.u32 4294901760, %v14026_v51 }
 0x37d   : > { %v14020_v36 = vand.u32 4294901760, %v14019_v49 }
 0x37f   : > { %v18758_v22 = vpack.c.bf16 %v14027_v2, %v14020_v36 }
 0x381   : > { %16170 = vmatmul.mubr.f32.vlgmr.msra.gmra.mrb[0].mxu1 %v18972_v62 }
 0x382   : > { %16967 = vmatpush3.bf16.msra.mxu1 %v18662_v26  ;;  %16176 = vmatprep.mubr.f32.mxu1 %v18973_v55  ;;  %v18977_v26 = vld [vmem:[#allocation21_spill] sm:$0xff] }
 0x383   : > { %16969 = vmatprep.subr.bf16.mxu1 %v18660_v33 }
 0x389   : > { %16177 = vmatmul.mubr.f32.vlgmr.msra.gmra.mrb[0].mxu1 %v18974_v48 }
 0x38a   : > { %16971 = vmatpush3.bf16.msra.mxu1 %v18660_v33  ;;  %16183 = vmatprep.mubr.f32.mxu1 %v18975_v43 }
 0x38b   : > { %16973 = vmatprep.subr.bf16.mxu1 %v18664_v39 }
 0x391   : > { %16184 = vmatmul.mubr.f32.vlgmr.msra.gmra.mrb[0].mxu1 %v18976_v23 }
 0x392   : > { %16975 = vmatpush3.bf16.msra.mxu1 %v18664_v39  ;;  %16190 = vmatprep.mubr.f32.mxu1 %v18971_v52  ;;  %v18978_v39 = vld [vmem:[#allocation22_spill] sm:$0xff] }
 0x393   : > { %16977 = vmatprep.subr.bf16.mxu1 %v18660_v33 }
 0x399   : > { %16191 = vmatmul.mubr.f32.vlgmr.msra.gmra.mrb[0].mxu1 %v18972_v62 }
 0x39a   : > { %16979 = vmatpush3.bf16.msra.mxu1 %v18660_v33  ;;  %16197 = vmatprep.mubr.f32.mxu1 %v18971_v52  ;;  %v18979_v33 = vld [vmem:[#allocation17_spill] sm:$0xff] }
 0x39b   : > { %17005 = vmatprep.subr.bf16.mxu1 %v18688_v46 }
 0x3a1   : > { %16198 = vmatmul.mubr.f32.vlgmr.msra.gmra.mrb[0].mxu1 %v18972_v62 }
 0x3a2   : > { %17007 = vmatpush3.bf16.msra.mxu1 %v18688_v46  ;;  %16246 = vmatprep.mubr.f32.mxu1 %v18977_v26 }
 0x3a3   : > { %17009 = vmatprep.subr.bf16.mxu1 %v18698_v11 }
 0x3a9   : > { %16247 = vmatmul.mubr.f32.vlgmr.msra.gmra.mrb[0].mxu1 %v18978_v39 }
 0x3aa   : > { %17011 = vmatpush3.bf16.msra.mxu1 %v18698_v11  ;;  %16253 = vmatprep.mubr.f32.mxu1 %v18364_v59  ;;  %v18982_v11 = vld [vmem:[#allocation20_spill] sm:$0xff] }
 0x3ab   : > { %17013 = vmatprep.subr.bf16.mxu1 %v18691_v18 }
 0x3b1   : > { %16254 = vmatmul.mubr.f32.vlgmr.msra.gmra.mrb[0].mxu1 %v18391_v47 }
 0x3b2   : > { %17015 = vmatpush3.bf16.msra.mxu1 %v18691_v18  ;;  %16260 = vmatprep.mubr.f32.mxu1 %v18979_v33 }
 0x3b3   : > { %17017 = vmatprep.subr.bf16.mxu1 %v18688_v46 }
 0x3b9   : > { %16261 = vmatmul.mubr.f32.vlgmr.msra.gmra.mrb[0].mxu1 %v18980_v37 }
 0x3ba   : > { %17019 = vmatpush3.bf16.msra.mxu1 %v18688_v46  ;;  %16267 = vmatprep.mubr.f32.mxu1 %v18981_v34 }
 0x3bb   : > { %17021 = vmatprep.subr.bf16.mxu1 %v18696_v58 }
 0x3c1   : > { %16268 = vmatmul.mubr.f32.vlgmr.msra.gmra.mrb[0].mxu1 %v18982_v11 }
 0x3c2   : > { %17023 = vmatpush3.bf16.msra.mxu1 %v18696_v58  ;;  %16274 = vmatprep.mubr.f32.mxu1 %v18364_v59 }
 0x3c3   : > { %17025 = vmatprep.subr.bf16.mxu1 %v18688_v46 }
 0x3c9   : > { %16275 = vmatmul.mubr.f32.vlgmr.msra.gmra.mrb[0].mxu1 %v18391_v47 }
 0x3ca   : > { %17027 = vmatpush3.bf16.msra.mxu1 %v18688_v46  ;;  %16281 = vmatprep.mubr.f32.mxu1 %v18364_v59 }
 0x3cb   : > { %17053 = vmatprep.subr.bf16.mxu1 %v18720_v27 }
 0x3d1   : > { %16282 = vmatmul.mubr.f32.vlgmr.msra.gmra.mrb[0].mxu1 %v18391_v47 }
 0x3d2   : > { %17055 = vmatpush3.bf16.msra.mxu1 %v18720_v27  ;;  %16330 = vmatprep.mubr.f32.mxu1 %v18529_v40 }
 0x3d3   : > { %17057 = vmatprep.subr.bf16.mxu1 %v18730_v14 }
 0x3d9   : > { %16331 = vmatmul.mubr.f32.vlgmr.msra.gmra.mrb[0].mxu1 %v18540_v28 }
 0x3da   : > { %17059 = vmatpush3.bf16.msra.mxu1 %v18730_v14  ;;  %16337 = vmatprep.mubr.f32.mxu1 %v18483_v19 }
 0x3db   : > { %17061 = vmatprep.subr.bf16.mxu1 %v18722_v12 }
 0x3e1   : > { %16338 = vmatmul.mubr.f32.vlgmr.msra.gmra.mrb[0].mxu1 %v18504_v44 }
 0x3e2   : > { %17063 = vmatpush3.bf16.msra.mxu1 %v18722_v12  ;;  %16344 = vmatprep.mubr.f32.mxu1 %v18497_v50 }
 0x3e3   : > { %17065 = vmatprep.subr.bf16.mxu1 %v18720_v27 }
 0x3e9   : > { %16345 = vmatmul.mubr.f32.vlgmr.msra.gmra.mrb[0].mxu1 %v18518_v30 }
 0x3ea   : > { %17067 = vmatpush3.bf16.msra.mxu1 %v18720_v27  ;;  %16351 = vmatprep.mubr.f32.mxu1 %v18509_v5 }
 0x3eb   : > { %17069 = vmatprep.subr.bf16.mxu1 %v18724_v21 }
 0x3f1   : > { %16352 = vmatmul.mubr.f32.vlgmr.msra.gmra.mrb[0].mxu1 %v18527_v31 }
 0x3f2   : > { %17071 = vmatpush3.bf16.msra.mxu1 %v18724_v21  ;;  %16358 = vmatprep.mubr.f32.mxu1 %v18483_v19 }
 0x3f3   : > { %17073 = vmatprep.subr.bf16.mxu1 %v18720_v27 }
 0x3f9   : > { %16359 = vmatmul.mubr.f32.vlgmr.msra.gmra.mrb[0].mxu1 %v18504_v44 }
 0x3fa   : > { %17075 = vmatpush3.bf16.msra.mxu1 %v18720_v27  ;;  %16365 = vmatprep.mubr.f32.mxu1 %v18483_v19 }
 0x3fb   : > { %17101 = vmatprep.subr.bf16.mxu1 %v18748_v32 }
 0x401   : > { %16366 = vmatmul.mubr.f32.vlgmr.msra.gmra.mrb[0].mxu1 %v18504_v44 }
 0x402   : > { %17103 = vmatpush3.bf16.msra.mxu1 %v18748_v32  ;;  %16414 = vmatprep.mubr.f32.mxu1 %v18610_v42 }
 0x403   : > { %17105 = vmatprep.subr.bf16.mxu1 %v18758_v22 }
 0x409   : > { %16415 = vmatmul.mubr.f32.vlgmr.msra.gmra.mrb[0].mxu1 %v18618_v63 }
 0x40a   : > { %17107 = vmatpush3.bf16.msra.mxu1 %v18758_v22  ;;  %16421 = vmatprep.mubr.f32.mxu1 %v18575_v53 }
 0x40b   : > { %17109 = vmatprep.subr.bf16.mxu1 %v18751_v6 }
 0x411   : > { %16422 = vmatmul.mubr.f32.vlgmr.msra.gmra.mrb[0].mxu1 %v18593_v3 }
 0x412   : > { %17111 = vmatpush3.bf16.msra.mxu1 %v18751_v6  ;;  %16428 = vmatprep.mubr.f32.mxu1 %v18587_v45 }
 0x413   : > { %17113 = vmatprep.subr.bf16.mxu1 %v18748_v32 }
 0x419   : > { %16429 = vmatmul.mubr.f32.vlgmr.msra.gmra.mrb[0].mxu1 %v18600_v17 }
 0x41a   : > { %17115 = vmatpush3.bf16.msra.mxu1 %v18748_v32  ;;  %16435 = vmatprep.mubr.f32.mxu1 %v18596_v1 }
 0x41b   : > { %17117 = vmatprep.subr.bf16.mxu1 %v18756_v41 }
 0x421   : > { %16436 = vmatmul.mubr.f32.vlgmr.msra.gmra.mrb[0].mxu1 %v18608_v13 }
 0x422   : > { %17119 = vmatpush3.bf16.msra.mxu1 %v18756_v41  ;;  %16442 = vmatprep.mubr.f32.mxu1 %v18575_v53 }
 0x423   : > { %17121 = vmatprep.subr.bf16.mxu1 %v18748_v32 }
 0x429   : > { %16443 = vmatmul.mubr.f32.vlgmr.msra.gmra.mrb[0].mxu1 %v18593_v3 }
 0x42a   : > { %17123 = vmatpush3.bf16.msra.mxu1 %v18748_v32  ;;  %16449 = vmatprep.mubr.f32.mxu1 %v18575_v53 }
 0x431   : > { %16450 = vmatmul.mubr.f32.vlgmr.msra.gmra.mrb[0].mxu1 %v18593_v3 }
 0x504   : > { %v16451_v47 = vpop.f32.mrb[0].mxu1 }
 0x505   : > { %v14597_v59 = vmul.f32 -1.442695, %v16451_v47  ;;  %v14420_v44 = vpop.f32.mrb[1].mxu1 }
 0x506   : > { %v14596_v19 = vmul.f32 -1.442695, %v14420_v44 }
 0x507   : > { %17505 = vpow2.f32 %v14597_v59 }
 0x508   : > { %17507 = vpow2.f32 %v14596_v19 }
 0x511   : > { %v17506_v50 = vpop.eup %17505 }
 0x512   : > { %v17508_v5 = vpop.eup %17507  ;;  %v14441_v30 = vadd.f32 1.0, %v17506_v50 }
 0x513   : > { %v14440_v31 = vadd.f32 1.0, %v17508_v5 }
 0x514   : > { %17509 = vrcp.f32 %v14441_v30 }
 0x515   : > { %17511 = vrcp.f32 %v14440_v31 }
 0x51e   : > { %v17510_v40 = vpop.eup %17509 }
 0x51f   : > { %v17512_v28 = vpop.eup %17511  ;;  %14447 = vst.msk [vmem:[%s17712_s21 + $0x8] sm:$0xff] %vm226_vm1, %v17510_v40 }
 0x520   : > { %14446 = vst.msk [vmem:[%s17712_s21] sm:$0xff] %vm226_vm1, %v17512_v28 }
 0x521 PF: > { %s14603_s6 = sshll.u32 %s17595_s16, 8  ;;  %s14462_s10 = sshll.u32 %s17712_s21, 4  ;;  %s18859_s10 = int_to_ptr.vmem [resolvable:$true] %s14462_s10 }
 0x522   : > { %s18856_s9 = scalar_lea.hbm %s18918_s3, %s14603_s6  ;;  %s18863_s11 = scalar_lea.sflag [#allocation5], %s186_s29 }
 0x523   : > { %s17513_s20 = scalar_lea.vmem %s18859_s10, 256  ;;  %s17611_s16 = smov [#allocation4]  }
 0x524   : > { %p17514_p2 = scmp.ne.s32.totalorder %s18859_s10, %s17513_s20  ;;  %s17517_s26 = sshll.u32 %s17611_s16, 4  ;;  %s17518_s26 = int_to_ptr.vmem [resolvable:$false] %s17517_s26 }
 0x525   : > { %s17519_s27 = scalar_lea.vmem %s17518_s26, 512  ;;  %p17520_p6 = scmp.lt.s32.totalorder %s18859_s10, %s17518_s26 }
 0x526   : > { %p17515_p4 = pnand %p17514_p2, %p17683_p3  ;;  %p17521_p7 = scmp.lt.s32.totalorder %s17519_s27, %s17513_s20 }
 0x528   : > { %p17516_p5 = pneg %p17515_p4  ;;  %p17522_p8 = por %p17521_p7, %p17520_p6 }
 0x52a   : > { %p17523_p10 = pnand %p17522_p8, %p17516_p5 }
 0x52c   : > { %17526 = shalt.err (!%p17523_p10)
}
 0x52d   : > { %s17527_s29 = scalar_lea.hbm %s18856_s9, 256  ;;  %s17531_s4 = scalar_lea.hbm %s18918_s3, 512 }
 0x52e   : > { %p17528_p11 = scmp.ne.s32.totalorder %s18856_s9, %s17527_s29  ;;  %p17532_p0 = scmp.lt.u32.totalorder %s18856_s9, %s18918_s3 }
 0x52f   : > { %p17533_p1 = scmp.lt.u32.totalorder %s17531_s4, %s17527_s29  ;;  %p17535_p4 = scmp.lt.u32.totalorder %s17527_s29, %s18856_s9 }
 0x530   : > { %p17529_p12 = pnand %p17528_p11, %p17683_p3 }
 0x531   : > { %p17534_p2 = por %p17533_p1, %p17532_p0 }
 0x532   : > { %p17530_p13 = pneg %p17529_p12 }
 0x533   : > { %p17536_p5 = por %p17535_p4, %p17534_p2 }
 0x535   : > { %p17537_p6 = pnand %p17536_p5, %p17530_p13 }
 0x537   : > { %17540 = shalt.err (!%p17537_p6)
}
 0x538   : > { %s17612_s6 = smov 128   ;;  %s17613_s7 = smov 8  }
 0x539   : > { %17430 = dma.vmem_to_hbm [thread:$0]  (%p17683_p3), %s18859_s10, 256, %s18856_s9, %s18863_s11, %s17612_s6, %s17612_s6, %s17613_s7  }
 0x53a PF: > { %p17436_p7 = scmp.ge.s32.totalorder %s17607_s19, 2  ;;  %s14477_s8 = sand.u32 1, %s17579_s12  }
 0x53b   : > { %s14478_s20 = scalar_lea.sflag [#allocation5], %s14477_s8 }
 0x53c   : > { %p17433_p8 = pnand %p17436_p7, %p17693_p9 }
 0x53e   : > { %17574 = dma.done.wait (!%p17433_p8), %s14478_s20, 256  }
 0x53f   : > { %17576 = vsyncadd (!%p17433_p8), %s14478_s20, 4294967040  ;;  %s16_s19 = sadd.s32 1, %s17607_s19   ;;  %s18983_s12 = smov %s17583_s13 }
 0x540   : > { %p13_p10 = scmp.ge.s32.totalorder %s16_s19, 6   ;;  %s18984_s13 = smov %s17587_s14 }
 0x541   : > { %s18985_s14 = smov %s17701_s28  ;;  %s18986_s15 = smov %s17599_s17 }
 0x542   : > { %s18987_s16 = smov %s17603_s18  ;;  %s18988_s17 = smov %s18991_s22 }
 0x543   : > { %s18989_s18 = smov %s18995_s23  ;;  %15 = sbr.rel (!%p13_p10) target bundleno = 5 (0x5), region = 95 }
 0x54a   :  { %14483 = vsyncpa [#allocation5], 1 }
 0x54b   :  { %14485 = vsyncpa [#allocation5 + $0x1], 1 }

</bundles_post_ra>
